<compile_context>
chip_gen: v5e
topology: v5e:2x2
jax: 0.10.0
libtpu: 0.0.40
codegen_flags: <defaults>
</compile_context>

<pallas_src>
import functools

import numpy as np
import jax
import jax.numpy as jnp
from jax import lax
from jax.experimental import pallas as pl
from jax.experimental.pallas import tpu as pltpu

_F32 = jnp.float32
_BF16 = jnp.bfloat16
_PER_BLOCK_INPUTS = 5          # w3, boundary mask, p_ch, pool row-sel, pool col-sel


# ----------------------------- in-kernel helpers -----------------------------

def _dotb(x, y):
    """bf16-operand MXU matmul with f32 accumulation."""
    return jnp.dot(x.astype(_BF16), y.astype(_BF16), preferred_element_type=_F32)


def _fused_block(a, w3, bmask, p_ch, rsel, csel, n, h, w, cout):
    """conv3x3(pad=1) [bias dropped: cancelled by BN] + BatchNorm(batch stats,
    eps=0, affine=False) + ReLU + 2x2/stride-2 max pool.

    a:     (n*h, w*cin) f32 activation, rows=(sample, row), lanes=(col, channel).
    w3:    (3*w*cin, w*cout) bf16 folded taps, stacked [row -1; row 0; row +1].
    bmask: (n*h, 2) f32; col 0: row above is in-sample, col 1: row below is.
    p_ch:  (w*cout, w*cout) f32, 1/w where channels match (stat redistribution).
    rsel:  (n*h//2, n*h) bf16 pool row compaction (even rows).
    csel:  (w*cout, (w//2)*cout) bf16 pool lane compaction (even cols).
    returns (n*(h//2), (w//2)*cout) f32 pooled activation (same layout).
    """
    nh, k_in = a.shape
    wc = w * cout

    # --- conv: build the h-1 / h+1 row copies with static slice+concat shifts
    # (zero padded per sample via bmask), lane-concatenate, and do the whole
    # 3x3 conv as ONE bf16 matmul with K = 3*w*cin.
    zrow = jnp.zeros((1, k_in), _F32)
    row_above = jnp.concatenate([zrow, a[:nh - 1, :]], axis=0) * bmask[:, 0:1]
    row_below = jnp.concatenate([a[1:, :], zrow], axis=0) * bmask[:, 1:2]
    a3 = jnp.concatenate([row_above, a, row_below], axis=1)
    y = _dotb(a3, w3)                                           # (nh, wc) f32

    # --- BatchNorm2d(eps=0, momentum=1, affine=False, track_running_stats=False):
    # mean and E[y^2] in one parallel pass (cross-sublane reduce on the XLU),
    # tiny f32 matmuls redistribute per-channel over the w lane groups.
    mean_r = jnp.mean(y, axis=0, keepdims=True)                 # (1, wc)
    msq_r = jnp.mean(y * y, axis=0, keepdims=True)              # (1, wc)
    mean = jnp.dot(mean_r, p_ch, preferred_element_type=_F32)
    msq = jnp.dot(msq_r, p_ch, preferred_element_type=_F32)
    var = jnp.maximum(msq - mean * mean, 0.0)                   # clamp cancellation
    y = jnp.maximum((y - mean) * lax.rsqrt(var), 0.0)           # eps=0: NaN only for
                                                                # a dead channel (= ref)

    # --- 2x2 / stride-2 max pool: neighbour shift + max (VPU), then a single
    # row-compaction matmul and a single lane-compaction matmul.
    ho = h // 2
    y_down = jnp.concatenate([y[1:, :], jnp.zeros((1, wc), _F32)], axis=0)
    rpair = jnp.maximum(y, y_down)                              # valid at even rows
    rmax = _dotb(rsel, rpair)                                   # (n*ho, wc)
    y_right = jnp.concatenate(
        [rmax[:, cout:], jnp.zeros((n * ho, cout), _F32)], axis=1)
    cpair = jnp.maximum(rmax, y_right)                          # valid at even cols
    return _dotb(cpair, csel)                                   # (n*ho, (w//2)*cout)


def _make_convnet_kernel(n, block_dims, h_final):
    nb = len(block_dims)

    def kernel(*refs):
        # refs: [x] + [w3, bmask, p_ch, rsel, csel]*nb + [fsel?] + [v, b_out] + [out]
        out_ref = refs[-1]
        a = refs[0][...]
        for idx, (h, w, cout) in enumerate(block_dims):
            base = 1 + _PER_BLOCK_INPUTS * idx
            a = _fused_block(a, refs[base][...], refs[base + 1][...],
                             refs[base + 2][...], refs[base + 3][...],
                             refs[base + 4][...], n, h, w, cout)

        pos = 1 + _PER_BLOCK_INPUTS * nb
        if h_final > 1:
            # flatten: gather the h_final row groups into lanes with precomputed
            # row selectors (torch's NCHW flatten order is folded into v).
            fsel_ref = refs[pos]
            pos += 1
            feats = jnp.concatenate(
                [_dotb(fsel_ref[hf], a) for hf in range(h_final)], axis=1)
        else:
            feats = a
        v_ref, b_ref = refs[pos], refs[pos + 1]
        out_ref[...] = _dotb(feats, v_ref[...]) + b_ref[...]

    return kernel


# ------------------------------ wrapper / prep --------------------------------

def _fold_tap_weight(wt, w, dh):
    """Fold conv-weight row `dh` into a (w*cin, w*cout) matrix applying both the
    w-shift (with zero padding) and the channel contraction in one matmul."""
    cout, cin, kh, kw = wt.shape
    ws = wt[:, :, dh + kh // 2, :]                      # (cout, cin, kw)
    w_in = jnp.arange(w)[:, None]
    w_out = jnp.arange(w)[None, :]
    kidx = w_in - w_out + kw // 2                       # (w, w)
    valid = (kidx >= 0) & (kidx < kw)
    tap = ws[:, :, jnp.clip(kidx, 0, kw - 1)]           # (cout, cin, w_in, w_out)
    tap = jnp.where(valid[None, None], tap, 0.0)
    return jnp.transpose(tap, (2, 1, 3, 0)).reshape(w * cin, w * cout)


def _fold_conv_weight(wt, w):
    return jnp.concatenate(
        [_fold_tap_weight(wt, w, dh) for dh in (-1, 0, 1)], axis=0).astype(_BF16)


def _boundary_mask(n, h):
    hh = np.arange(n * h) % h
    return jnp.asarray(np.stack([hh != 0, hh != h - 1], axis=1).astype(np.float32))


def _channel_mean_matrix(w, cout):
    wc = w * cout
    i = np.arange(wc)
    return jnp.asarray(
        (i[:, None] % cout == i[None, :] % cout).astype(np.float32) / w)


def _pool_row_selector(n, h):
    ho = h // 2
    sel = np.zeros((n * ho, n * h), np.float32)
    o = np.arange(n * ho)
    sel[o, (o // ho) * h + 2 * (o % ho)] = 1.0
    return jnp.asarray(sel).astype(_BF16)


def _pool_col_selector(w, cout):
    wo = w // 2
    sel = np.zeros((w * cout, wo * cout), np.float32)
    j = np.arange(wo * cout)
    sel[(2 * (j // cout)) * cout + (j % cout), j] = 1.0
    return jnp.asarray(sel).astype(_BF16)


def _flatten_row_selector(n, h):
    sel = np.zeros((h, n, n * h), np.float32)
    for hf in range(h):
        sel[hf, np.arange(n), np.arange(n) * h + hf] = 1.0
    return jnp.asarray(sel).astype(_BF16)


@functools.partial(jax.jit, static_argnames=("num_blocks", "dim_output"))
def convnet_forward(x_nchw, weights, num_blocks, dim_output):
    """Pallas version of ConvNet.forward(x, w) (p_dropout=0, feat=False)."""
    n, c, h, w = x_nchw.shape
    # rows=(n, h), lanes=(w, c) layout; one transpose at the input boundary.
    inputs = [jnp.transpose(x_nchw, (0, 2, 3, 1)).reshape(n * h, w * c)]
    block_dims = []
    for i in range(num_blocks):
        wt = weights[f"conv{i + 1}"]
        if wt.shape[2] != 3 or wt.shape[3] != 3:
            raise NotImplementedError("fused kernel assumes 3x3 filters")
        cout = wt.shape[0]
        # conv bias w[f"b{i+1}"] is intentionally dropped: BatchNorm with
        # affine=False, eps=0 and batch statistics cancels it exactly.
        inputs.append(_fold_conv_weight(wt, w))
        inputs.append(_boundary_mask(n, h))
        inputs.append(_channel_mean_matrix(w, cout))
        inputs.append(_pool_row_selector(n, h))
        inputs.append(_pool_col_selector(w, cout))
        block_dims.append((h, w, cout))
        h, w, c = h // 2, w // 2, cout

    if h > 1:
        inputs.append(_flatten_row_selector(n, h))

    if dim_output is not None:
        w_lin = weights[f"w{num_blocks + 1}"]
        b_lin = weights[f"b{num_blocks + 1}"]
        dim_out = w_lin.shape[0]
    else:
        # dim_output=None: return flattened features (identity "linear" whose
        # weight is the permutation to torch's NCHW flatten order).
        dim_out = c * h * w
        w_lin = jnp.eye(dim_out, dtype=_F32)
        b_lin = jnp.zeros((dim_out,), _F32)
    # fold torch's (c, h, w) flatten order + the transpose into the linear weight
    v = jnp.transpose(w_lin.reshape(dim_out, c, h, w), (2, 3, 1, 0))
    inputs.append(v.reshape(h * w * c, dim_out).astype(_BF16))
    inputs.append(b_lin.reshape(1, dim_out).astype(_F32))

    kernel = _make_convnet_kernel(n, tuple(block_dims), h)
    return pl.pallas_call(
        kernel,
        out_shape=jax.ShapeDtypeStruct((n, dim_out), _F32),
        in_specs=[pl.BlockSpec(memory_space=pltpu.MemorySpace.VMEM)] * len(inputs),
        out_specs=pl.BlockSpec(memory_space=pltpu.MemorySpace.VMEM),
        # total working set is well under a few MiB; keep the limit modest so it
        # also fits v7x's smaller VMEM without over-reserving.
        compiler_params=pltpu.CompilerParams(vmem_limit_bytes=16 * 1024 * 1024),
    )(*inputs)


# ---------------------------- pure-JAX reference ------------------------------

def reference_forward(x_nchw, weights, num_blocks, dim_output):
    out = x_nchw
    hi = jax.lax.Precision.HIGHEST
    for i in range(num_blocks):
        w = weights[f"conv{i + 1}"]
        b = weights[f"b{i + 1}"]
        out = jax.lax.conv_general_dilated(
            out, w, window_strides=(1, 1), padding=((1, 1), (1, 1)),
            dimension_numbers=("NCHW", "OIHW", "NCHW"), precision=hi)
        out = out + b.reshape(1, -1, 1, 1)
        mean = jnp.mean(out, axis=(0, 2, 3), keepdims=True)
        var = jnp.mean((out - mean) ** 2, axis=(0, 2, 3), keepdims=True)
        out = (out - mean) * jax.lax.rsqrt(var)
        out = jnp.maximum(out, 0.0)
        out = jax.lax.reduce_window(out, -jnp.inf, jax.lax.max,
                                    (1, 1, 2, 2), (1, 1, 2, 2), "VALID")
    out = out.reshape(out.shape[0], -1)
    if dim_output is not None:
        k = num_blocks + 1
        out = jnp.dot(out, weights[f"w{k}"].T, precision=hi) + weights[f"b{k}"]
    return out


# -------------------------------- weight init ---------------------------------

def init_weights(key, in_channels, num_filters, filter_size, dim_output, final_spatial):
    """Mirrors ConvNet.initialize_weights: kaiming_normal(fan_in, relu) + zero biases."""
    w = {}
    num_channels = [in_channels] + list(num_filters)
    kh, kw = filter_size
    keys = jax.random.split(key, len(num_filters) + 1)
    for i in range(len(num_filters)):
        cin, cout = num_channels[i], num_channels[i + 1]
        std = np.sqrt(2.0 / (cin * kh * kw))
        w[f"conv{i + 1}"] = std * jax.random.normal(
            keys[i], (cout, cin, kh, kw), _F32)
        w[f"b{i + 1}"] = jnp.zeros((cout,), _F32)
    if dim_output is not None:
        k = len(num_filters) + 1
        feat_dim = num_channels[-1] * int(np.prod(final_spatial))
        std = np.sqrt(2.0 / feat_dim)
        w[f"w{k}"] = std * jax.random.normal(keys[-1], (dim_output, feat_dim), _F32)
        w[f"b{k}"] = jnp.zeros((dim_output,), _F32)
    return w


# ------------------------------------ main -------------------------------------

if __name__ == "__main__":
    n, cin, hh, ww = 2, 4, 16, 16
    num_filters = [8, 8, 8, 8]
    filter_size = (3, 3)
    dim_output = 10

    # get_dim_features equivalent: 3x3/pad1/stride1 conv keeps spatial, 2x2 pool
    # halves it: 16 -> 8 -> 4 -> 2 -> 1.
    fh, fw = hh, ww
    for _ in num_filters:
        fh, fw = fh // 2, fw // 2

    key = jax.random.PRNGKey(0)
    k_x, k_w = jax.random.split(key)
    x = jax.random.normal(k_x, (n, cin, hh, ww), _F32)           # NCHW input
    weights = init_weights(k_w, cin, num_filters, filter_size, dim_output, (fh, fw))

    out = convnet_forward(x, weights, num_blocks=len(num_filters),
                          dim_output=dim_output)
    out = jax.block_until_ready(out)

    ref = jax.block_until_ready(
        reference_forward(x, weights, len(num_filters), dim_output))

    assert out.shape == (n, dim_output), out.shape
    # Tolerance loosened vs. the fp32 version: the kernel now uses bf16 MXU
    # operands (f32 accumulation) per the performance review.
    np.testing.assert_allclose(np.asarray(out), np.asarray(ref), rtol=5e-2, atol=5e-2)
    print("KERNEL_OK")
</pallas_src>

<mosaic_0001>
module attributes {stable_mosaic.version = 11 : i64} {
  func.func @kernel(%arg0: memref<32x64xf32, #tpu.memory_space<vmem>>, %arg1: memref<192x128xbf16, #tpu.memory_space<vmem>>, %arg2: memref<32x2xf32, #tpu.memory_space<vmem>>, %arg3: memref<128x128xf32, #tpu.memory_space<vmem>>, %arg4: memref<16x32xbf16, #tpu.memory_space<vmem>>, %arg5: memref<128x64xbf16, #tpu.memory_space<vmem>>, %arg6: memref<192x64xbf16, #tpu.memory_space<vmem>>, %arg7: memref<16x2xf32, #tpu.memory_space<vmem>>, %arg8: memref<64x64xf32, #tpu.memory_space<vmem>>, %arg9: memref<8x16xbf16, #tpu.memory_space<vmem>>, %arg10: memref<64x32xbf16, #tpu.memory_space<vmem>>, %arg11: memref<96x32xbf16, #tpu.memory_space<vmem>>, %arg12: memref<8x2xf32, #tpu.memory_space<vmem>>, %arg13: memref<32x32xf32, #tpu.memory_space<vmem>>, %arg14: memref<4x8xbf16, #tpu.memory_space<vmem>>, %arg15: memref<32x16xbf16, #tpu.memory_space<vmem>>, %arg16: memref<48x16xbf16, #tpu.memory_space<vmem>>, %arg17: memref<4x2xf32, #tpu.memory_space<vmem>>, %arg18: memref<16x16xf32, #tpu.memory_space<vmem>>, %arg19: memref<2x4xbf16, #tpu.memory_space<vmem>>, %arg20: memref<16x8xbf16, #tpu.memory_space<vmem>>, %arg21: memref<8x10xbf16, #tpu.memory_space<vmem>>, %arg22: memref<1x10xf32, #tpu.memory_space<vmem>>, %arg23: memref<2x10xf32, #tpu.memory_space<vmem>>) attributes {dimension_semantics = [], scalar_prefetch = 0 : i64, scratch_operands = 0 : i64, tpu.core_type = #tpu.core_type<tc>} {
    %c0 = arith.constant 0 : index
    %c0_0 = arith.constant 0 : index
    %0 = vector.load %arg0[%c0, %c0_0] : memref<32x64xf32, #tpu.memory_space<vmem>>, vector<32x64xf32>
    %c0_1 = arith.constant 0 : index
    %c0_2 = arith.constant 0 : index
    %1 = vector.load %arg1[%c0_1, %c0_2] : memref<192x128xbf16, #tpu.memory_space<vmem>>, vector<192x128xbf16>
    %c0_3 = arith.constant 0 : index
    %c0_4 = arith.constant 0 : index
    %2 = vector.load %arg2[%c0_3, %c0_4] : memref<32x2xf32, #tpu.memory_space<vmem>>, vector<32x2xf32>
    %c0_5 = arith.constant 0 : index
    %c0_6 = arith.constant 0 : index
    %3 = vector.load %arg3[%c0_5, %c0_6] : memref<128x128xf32, #tpu.memory_space<vmem>>, vector<128x128xf32>
    %c0_7 = arith.constant 0 : index
    %c0_8 = arith.constant 0 : index
    %4 = vector.load %arg4[%c0_7, %c0_8] : memref<16x32xbf16, #tpu.memory_space<vmem>>, vector<16x32xbf16>
    %c0_9 = arith.constant 0 : index
    %c0_10 = arith.constant 0 : index
    %5 = vector.load %arg5[%c0_9, %c0_10] : memref<128x64xbf16, #tpu.memory_space<vmem>>, vector<128x64xbf16>
    %cst = arith.constant 0.000000e+00 : f32
    %6 = vector.broadcast %cst : f32 to vector<1x64xf32>
    %7 = vector.extract_strided_slice %0 {offsets = [0, 0], sizes = [31, 64], strides = [1, 1]} : vector<32x64xf32> to vector<31x64xf32>
    %8 = tpu.concatenate %6, %7 in 0 : vector<1x64xf32>, vector<31x64xf32> -> vector<32x64xf32>
    %9 = vector.extract_strided_slice %2 {offsets = [0, 0], sizes = [32, 1], strides = [1, 1]} : vector<32x2xf32> to vector<32x1xf32>
    %10 = vector.broadcast %9 : vector<32x1xf32> to vector<32x64xf32>
    %11 = arith.mulf %8, %10 : vector<32x64xf32>
    %12 = vector.extract_strided_slice %0 {offsets = [1, 0], sizes = [31, 64], strides = [1, 1]} : vector<32x64xf32> to vector<31x64xf32>
    %13 = tpu.concatenate %12, %6 in 0 : vector<31x64xf32>, vector<1x64xf32> -> vector<32x64xf32>
    %14 = vector.extract_strided_slice %2 {offsets = [0, 1], sizes = [32, 1], strides = [1, 1]} : vector<32x2xf32> to vector<32x1xf32>
    %15 = vector.broadcast %14 : vector<32x1xf32> to vector<32x64xf32>
    %16 = arith.mulf %13, %15 : vector<32x64xf32>
    %17 = tpu.concatenate %11, %0, %16 in 1 : vector<32x64xf32>, vector<32x64xf32>, vector<32x64xf32> -> vector<32x192xf32>
    %18 = arith.truncf %17 : vector<32x192xf32> to vector<32x192xbf16>
    %cst_11 = arith.constant dense<0.000000e+00> : vector<32x128xf32>
    %19 = tpu.matmul %18, %1, %cst_11 {dimension_numbers = #tpu.dot_dimension_numbers<[1], [0], [0], [1], [0, 0, 1, 1], [], []>} : vector<32x192xbf16>, vector<192x128xbf16>, vector<32x128xf32> -> vector<32x128xf32>
    %cst_12 = arith.constant dense<0.000000e+00> : vector<128xf32>
    %20 = vector.multi_reduction <add>, %19, %cst_12 [0] : vector<32x128xf32> to vector<128xf32>
    %21 = vector.shape_cast %20 : vector<128xf32> to vector<1x128xf32>
    %cst_13 = arith.constant 3.200000e+01 : f32
    %22 = vector.broadcast %cst_13 : f32 to vector<1x128xf32>
    %23 = arith.divf %21, %22 : vector<1x128xf32>
    %24 = arith.mulf %19, %19 : vector<32x128xf32>
    %cst_14 = arith.constant dense<0.000000e+00> : vector<128xf32>
    %25 = vector.multi_reduction <add>, %24, %cst_14 [0] : vector<32x128xf32> to vector<128xf32>
    %26 = vector.shape_cast %25 : vector<128xf32> to vector<1x128xf32>
    %cst_15 = arith.constant 3.200000e+01 : f32
    %27 = vector.broadcast %cst_15 : f32 to vector<1x128xf32>
    %28 = arith.divf %26, %27 : vector<1x128xf32>
    %cst_16 = arith.constant dense<0.000000e+00> : vector<1x128xf32>
    %29 = tpu.matmul %23, %3, %cst_16 {dimension_numbers = #tpu.dot_dimension_numbers<[1], [0], [0], [1], [0, 0, 1, 1], [], []>} : vector<1x128xf32>, vector<128x128xf32>, vector<1x128xf32> -> vector<1x128xf32>
    %cst_17 = arith.constant dense<0.000000e+00> : vector<1x128xf32>
    %30 = tpu.matmul %28, %3, %cst_17 {dimension_numbers = #tpu.dot_dimension_numbers<[1], [0], [0], [1], [0, 0, 1, 1], [], []>} : vector<1x128xf32>, vector<128x128xf32>, vector<1x128xf32> -> vector<1x128xf32>
    %31 = arith.mulf %29, %29 : vector<1x128xf32>
    %32 = arith.subf %30, %31 : vector<1x128xf32>
    %cst_18 = arith.constant 0.000000e+00 : f32
    %33 = vector.broadcast %cst_18 : f32 to vector<1x128xf32>
    %34 = arith.maximumf %32, %33 : vector<1x128xf32>
    %35 = vector.broadcast %29 : vector<1x128xf32> to vector<32x128xf32>
    %36 = arith.subf %19, %35 : vector<32x128xf32>
    %37 = math.rsqrt %34 : vector<1x128xf32>
    %38 = vector.broadcast %37 : vector<1x128xf32> to vector<32x128xf32>
    %39 = arith.mulf %36, %38 : vector<32x128xf32>
    %cst_19 = arith.constant 0.000000e+00 : f32
    %40 = vector.broadcast %cst_19 : f32 to vector<32x128xf32>
    %41 = arith.maximumf %39, %40 : vector<32x128xf32>
    %42 = vector.extract_strided_slice %41 {offsets = [1, 0], sizes = [31, 128], strides = [1, 1]} : vector<32x128xf32> to vector<31x128xf32>
    %cst_20 = arith.constant 0.000000e+00 : f32
    %43 = vector.broadcast %cst_20 : f32 to vector<1x128xf32>
    %44 = tpu.concatenate %42, %43 in 0 : vector<31x128xf32>, vector<1x128xf32> -> vector<32x128xf32>
    %45 = arith.maximumf %41, %44 : vector<32x128xf32>
    %46 = arith.truncf %45 : vector<32x128xf32> to vector<32x128xbf16>
    %cst_21 = arith.constant dense<0.000000e+00> : vector<16x128xf32>
    %47 = tpu.matmul %4, %46, %cst_21 {dimension_numbers = #tpu.dot_dimension_numbers<[1], [0], [0], [1], [0, 0, 1, 1], [], []>} : vector<16x32xbf16>, vector<32x128xbf16>, vector<16x128xf32> -> vector<16x128xf32>
    %48 = vector.extract_strided_slice %47 {offsets = [0, 8], sizes = [16, 120], strides = [1, 1]} : vector<16x128xf32> to vector<16x120xf32>
    %cst_22 = arith.constant 0.000000e+00 : f32
    %49 = vector.broadcast %cst_22 : f32 to vector<16x8xf32>
    %50 = tpu.concatenate %48, %49 in 1 : vector<16x120xf32>, vector<16x8xf32> -> vector<16x128xf32>
    %51 = arith.maximumf %47, %50 : vector<16x128xf32>
    %52 = arith.truncf %51 : vector<16x128xf32> to vector<16x128xbf16>
    %cst_23 = arith.constant dense<0.000000e+00> : vector<16x64xf32>
    %53 = tpu.matmul %52, %5, %cst_23 {dimension_numbers = #tpu.dot_dimension_numbers<[1], [0], [0], [1], [0, 0, 1, 1], [], []>} : vector<16x128xbf16>, vector<128x64xbf16>, vector<16x64xf32> -> vector<16x64xf32>
    %c0_24 = arith.constant 0 : index
    %c0_25 = arith.constant 0 : index
    %54 = vector.load %arg6[%c0_24, %c0_25] : memref<192x64xbf16, #tpu.memory_space<vmem>>, vector<192x64xbf16>
    %c0_26 = arith.constant 0 : index
    %c0_27 = arith.constant 0 : index
    %55 = vector.load %arg7[%c0_26, %c0_27] : memref<16x2xf32, #tpu.memory_space<vmem>>, vector<16x2xf32>
    %c0_28 = arith.constant 0 : index
    %c0_29 = arith.constant 0 : index
    %56 = vector.load %arg8[%c0_28, %c0_29] : memref<64x64xf32, #tpu.memory_space<vmem>>, vector<64x64xf32>
    %c0_30 = arith.constant 0 : index
    %c0_31 = arith.constant 0 : index
    %57 = vector.load %arg9[%c0_30, %c0_31] : memref<8x16xbf16, #tpu.memory_space<vmem>>, vector<8x16xbf16>
    %c0_32 = arith.constant 0 : index
    %c0_33 = arith.constant 0 : index
    %58 = vector.load %arg10[%c0_32, %c0_33] : memref<64x32xbf16, #tpu.memory_space<vmem>>, vector<64x32xbf16>
    %cst_34 = arith.constant 0.000000e+00 : f32
    %59 = vector.broadcast %cst_34 : f32 to vector<1x64xf32>
    %60 = vector.extract_strided_slice %53 {offsets = [0, 0], sizes = [15, 64], strides = [1, 1]} : vector<16x64xf32> to vector<15x64xf32>
    %61 = tpu.concatenate %59, %60 in 0 : vector<1x64xf32>, vector<15x64xf32> -> vector<16x64xf32>
    %62 = vector.extract_strided_slice %55 {offsets = [0, 0], sizes = [16, 1], strides = [1, 1]} : vector<16x2xf32> to vector<16x1xf32>
    %63 = vector.broadcast %62 : vector<16x1xf32> to vector<16x64xf32>
    %64 = arith.mulf %61, %63 : vector<16x64xf32>
    %65 = vector.extract_strided_slice %53 {offsets = [1, 0], sizes = [15, 64], strides = [1, 1]} : vector<16x64xf32> to vector<15x64xf32>
    %66 = tpu.concatenate %65, %59 in 0 : vector<15x64xf32>, vector<1x64xf32> -> vector<16x64xf32>
    %67 = vector.extract_strided_slice %55 {offsets = [0, 1], sizes = [16, 1], strides = [1, 1]} : vector<16x2xf32> to vector<16x1xf32>
    %68 = vector.broadcast %67 : vector<16x1xf32> to vector<16x64xf32>
    %69 = arith.mulf %66, %68 : vector<16x64xf32>
    %70 = tpu.concatenate %64, %53, %69 in 1 : vector<16x64xf32>, vector<16x64xf32>, vector<16x64xf32> -> vector<16x192xf32>
    %71 = arith.truncf %70 : vector<16x192xf32> to vector<16x192xbf16>
    %cst_35 = arith.constant dense<0.000000e+00> : vector<16x64xf32>
    %72 = tpu.matmul %71, %54, %cst_35 {dimension_numbers = #tpu.dot_dimension_numbers<[1], [0], [0], [1], [0, 0, 1, 1], [], []>} : vector<16x192xbf16>, vector<192x64xbf16>, vector<16x64xf32> -> vector<16x64xf32>
    %cst_36 = arith.constant dense<0.000000e+00> : vector<64xf32>
    %73 = vector.multi_reduction <add>, %72, %cst_36 [0] : vector<16x64xf32> to vector<64xf32>
    %74 = vector.shape_cast %73 : vector<64xf32> to vector<1x64xf32>
    %cst_37 = arith.constant 1.600000e+01 : f32
    %75 = vector.broadcast %cst_37 : f32 to vector<1x64xf32>
    %76 = arith.divf %74, %75 : vector<1x64xf32>
    %77 = arith.mulf %72, %72 : vector<16x64xf32>
    %cst_38 = arith.constant dense<0.000000e+00> : vector<64xf32>
    %78 = vector.multi_reduction <add>, %77, %cst_38 [0] : vector<16x64xf32> to vector<64xf32>
    %79 = vector.shape_cast %78 : vector<64xf32> to vector<1x64xf32>
    %cst_39 = arith.constant 1.600000e+01 : f32
    %80 = vector.broadcast %cst_39 : f32 to vector<1x64xf32>
    %81 = arith.divf %79, %80 : vector<1x64xf32>
    %cst_40 = arith.constant dense<0.000000e+00> : vector<1x64xf32>
    %82 = tpu.matmul %76, %56, %cst_40 {dimension_numbers = #tpu.dot_dimension_numbers<[1], [0], [0], [1], [0, 0, 1, 1], [], []>} : vector<1x64xf32>, vector<64x64xf32>, vector<1x64xf32> -> vector<1x64xf32>
    %cst_41 = arith.constant dense<0.000000e+00> : vector<1x64xf32>
    %83 = tpu.matmul %81, %56, %cst_41 {dimension_numbers = #tpu.dot_dimension_numbers<[1], [0], [0], [1], [0, 0, 1, 1], [], []>} : vector<1x64xf32>, vector<64x64xf32>, vector<1x64xf32> -> vector<1x64xf32>
    %84 = arith.mulf %82, %82 : vector<1x64xf32>
    %85 = arith.subf %83, %84 : vector<1x64xf32>
    %cst_42 = arith.constant 0.000000e+00 : f32
    %86 = vector.broadcast %cst_42 : f32 to vector<1x64xf32>
    %87 = arith.maximumf %85, %86 : vector<1x64xf32>
    %88 = vector.broadcast %82 : vector<1x64xf32> to vector<16x64xf32>
    %89 = arith.subf %72, %88 : vector<16x64xf32>
    %90 = math.rsqrt %87 : vector<1x64xf32>
    %91 = vector.broadcast %90 : vector<1x64xf32> to vector<16x64xf32>
    %92 = arith.mulf %89, %91 : vector<16x64xf32>
    %cst_43 = arith.constant 0.000000e+00 : f32
    %93 = vector.broadcast %cst_43 : f32 to vector<16x64xf32>
    %94 = arith.maximumf %92, %93 : vector<16x64xf32>
    %95 = vector.extract_strided_slice %94 {offsets = [1, 0], sizes = [15, 64], strides = [1, 1]} : vector<16x64xf32> to vector<15x64xf32>
    %cst_44 = arith.constant 0.000000e+00 : f32
    %96 = vector.broadcast %cst_44 : f32 to vector<1x64xf32>
    %97 = tpu.concatenate %95, %96 in 0 : vector<15x64xf32>, vector<1x64xf32> -> vector<16x64xf32>
    %98 = arith.maximumf %94, %97 : vector<16x64xf32>
    %99 = arith.truncf %98 : vector<16x64xf32> to vector<16x64xbf16>
    %cst_45 = arith.constant dense<0.000000e+00> : vector<8x64xf32>
    %100 = tpu.matmul %57, %99, %cst_45 {dimension_numbers = #tpu.dot_dimension_numbers<[1], [0], [0], [1], [0, 0, 1, 1], [], []>} : vector<8x16xbf16>, vector<16x64xbf16>, vector<8x64xf32> -> vector<8x64xf32>
    %101 = vector.extract_strided_slice %100 {offsets = [0, 8], sizes = [8, 56], strides = [1, 1]} : vector<8x64xf32> to vector<8x56xf32>
    %cst_46 = arith.constant 0.000000e+00 : f32
    %102 = vector.broadcast %cst_46 : f32 to vector<8x8xf32>
    %103 = tpu.concatenate %101, %102 in 1 : vector<8x56xf32>, vector<8x8xf32> -> vector<8x64xf32>
    %104 = arith.maximumf %100, %103 : vector<8x64xf32>
    %105 = arith.truncf %104 : vector<8x64xf32> to vector<8x64xbf16>
    %cst_47 = arith.constant dense<0.000000e+00> : vector<8x32xf32>
    %106 = tpu.matmul %105, %58, %cst_47 {dimension_numbers = #tpu.dot_dimension_numbers<[1], [0], [0], [1], [0, 0, 1, 1], [], []>} : vector<8x64xbf16>, vector<64x32xbf16>, vector<8x32xf32> -> vector<8x32xf32>
    %c0_48 = arith.constant 0 : index
    %c0_49 = arith.constant 0 : index
    %107 = vector.load %arg11[%c0_48, %c0_49] : memref<96x32xbf16, #tpu.memory_space<vmem>>, vector<96x32xbf16>
    %c0_50 = arith.constant 0 : index
    %c0_51 = arith.constant 0 : index
    %108 = vector.load %arg12[%c0_50, %c0_51] : memref<8x2xf32, #tpu.memory_space<vmem>>, vector<8x2xf32>
    %c0_52 = arith.constant 0 : index
    %c0_53 = arith.constant 0 : index
    %109 = vector.load %arg13[%c0_52, %c0_53] : memref<32x32xf32, #tpu.memory_space<vmem>>, vector<32x32xf32>
    %c0_54 = arith.constant 0 : index
    %c0_55 = arith.constant 0 : index
    %110 = vector.load %arg14[%c0_54, %c0_55] : memref<4x8xbf16, #tpu.memory_space<vmem>>, vector<4x8xbf16>
    %c0_56 = arith.constant 0 : index
    %c0_57 = arith.constant 0 : index
    %111 = vector.load %arg15[%c0_56, %c0_57] : memref<32x16xbf16, #tpu.memory_space<vmem>>, vector<32x16xbf16>
    %cst_58 = arith.constant 0.000000e+00 : f32
    %112 = vector.broadcast %cst_58 : f32 to vector<1x32xf32>
    %113 = vector.extract_strided_slice %106 {offsets = [0, 0], sizes = [7, 32], strides = [1, 1]} : vector<8x32xf32> to vector<7x32xf32>
    %114 = tpu.concatenate %112, %113 in 0 : vector<1x32xf32>, vector<7x32xf32> -> vector<8x32xf32>
    %115 = vector.extract_strided_slice %108 {offsets = [0, 0], sizes = [8, 1], strides = [1, 1]} : vector<8x2xf32> to vector<8x1xf32>
    %116 = vector.broadcast %115 : vector<8x1xf32> to vector<8x32xf32>
    %117 = arith.mulf %114, %116 : vector<8x32xf32>
    %118 = vector.extract_strided_slice %106 {offsets = [1, 0], sizes = [7, 32], strides = [1, 1]} : vector<8x32xf32> to vector<7x32xf32>
    %119 = tpu.concatenate %118, %112 in 0 : vector<7x32xf32>, vector<1x32xf32> -> vector<8x32xf32>
    %120 = vector.extract_strided_slice %108 {offsets = [0, 1], sizes = [8, 1], strides = [1, 1]} : vector<8x2xf32> to vector<8x1xf32>
    %121 = vector.broadcast %120 : vector<8x1xf32> to vector<8x32xf32>
    %122 = arith.mulf %119, %121 : vector<8x32xf32>
    %123 = tpu.concatenate %117, %106, %122 in 1 : vector<8x32xf32>, vector<8x32xf32>, vector<8x32xf32> -> vector<8x96xf32>
    %124 = arith.truncf %123 : vector<8x96xf32> to vector<8x96xbf16>
    %cst_59 = arith.constant dense<0.000000e+00> : vector<8x32xf32>
    %125 = tpu.matmul %124, %107, %cst_59 {dimension_numbers = #tpu.dot_dimension_numbers<[1], [0], [0], [1], [0, 0, 1, 1], [], []>} : vector<8x96xbf16>, vector<96x32xbf16>, vector<8x32xf32> -> vector<8x32xf32>
    %cst_60 = arith.constant dense<0.000000e+00> : vector<32xf32>
    %126 = vector.multi_reduction <add>, %125, %cst_60 [0] : vector<8x32xf32> to vector<32xf32>
    %127 = vector.shape_cast %126 : vector<32xf32> to vector<1x32xf32>
    %cst_61 = arith.constant 8.000000e+00 : f32
    %128 = vector.broadcast %cst_61 : f32 to vector<1x32xf32>
    %129 = arith.divf %127, %128 : vector<1x32xf32>
    %130 = arith.mulf %125, %125 : vector<8x32xf32>
    %cst_62 = arith.constant dense<0.000000e+00> : vector<32xf32>
    %131 = vector.multi_reduction <add>, %130, %cst_62 [0] : vector<8x32xf32> to vector<32xf32>
    %132 = vector.shape_cast %131 : vector<32xf32> to vector<1x32xf32>
    %cst_63 = arith.constant 8.000000e+00 : f32
    %133 = vector.broadcast %cst_63 : f32 to vector<1x32xf32>
    %134 = arith.divf %132, %133 : vector<1x32xf32>
    %cst_64 = arith.constant dense<0.000000e+00> : vector<1x32xf32>
    %135 = tpu.matmul %129, %109, %cst_64 {dimension_numbers = #tpu.dot_dimension_numbers<[1], [0], [0], [1], [0, 0, 1, 1], [], []>} : vector<1x32xf32>, vector<32x32xf32>, vector<1x32xf32> -> vector<1x32xf32>
    %cst_65 = arith.constant dense<0.000000e+00> : vector<1x32xf32>
    %136 = tpu.matmul %134, %109, %cst_65 {dimension_numbers = #tpu.dot_dimension_numbers<[1], [0], [0], [1], [0, 0, 1, 1], [], []>} : vector<1x32xf32>, vector<32x32xf32>, vector<1x32xf32> -> vector<1x32xf32>
    %137 = arith.mulf %135, %135 : vector<1x32xf32>
    %138 = arith.subf %136, %137 : vector<1x32xf32>
    %cst_66 = arith.constant 0.000000e+00 : f32
    %139 = vector.broadcast %cst_66 : f32 to vector<1x32xf32>
    %140 = arith.maximumf %138, %139 : vector<1x32xf32>
    %141 = vector.broadcast %135 : vector<1x32xf32> to vector<8x32xf32>
    %142 = arith.subf %125, %141 : vector<8x32xf32>
    %143 = math.rsqrt %140 : vector<1x32xf32>
    %144 = vector.broadcast %143 : vector<1x32xf32> to vector<8x32xf32>
    %145 = arith.mulf %142, %144 : vector<8x32xf32>
    %cst_67 = arith.constant 0.000000e+00 : f32
    %146 = vector.broadcast %cst_67 : f32 to vector<8x32xf32>
    %147 = arith.maximumf %145, %146 : vector<8x32xf32>
    %148 = vector.extract_strided_slice %147 {offsets = [1, 0], sizes = [7, 32], strides = [1, 1]} : vector<8x32xf32> to vector<7x32xf32>
    %cst_68 = arith.constant 0.000000e+00 : f32
    %149 = vector.broadcast %cst_68 : f32 to vector<1x32xf32>
    %150 = tpu.concatenate %148, %149 in 0 : vector<7x32xf32>, vector<1x32xf32> -> vector<8x32xf32>
    %151 = arith.maximumf %147, %150 : vector<8x32xf32>
    %152 = arith.truncf %151 : vector<8x32xf32> to vector<8x32xbf16>
    %cst_69 = arith.constant dense<0.000000e+00> : vector<4x32xf32>
    %153 = tpu.matmul %110, %152, %cst_69 {dimension_numbers = #tpu.dot_dimension_numbers<[1], [0], [0], [1], [0, 0, 1, 1], [], []>} : vector<4x8xbf16>, vector<8x32xbf16>, vector<4x32xf32> -> vector<4x32xf32>
    %154 = vector.extract_strided_slice %153 {offsets = [0, 8], sizes = [4, 24], strides = [1, 1]} : vector<4x32xf32> to vector<4x24xf32>
    %cst_70 = arith.constant 0.000000e+00 : f32
    %155 = vector.broadcast %cst_70 : f32 to vector<4x8xf32>
    %156 = tpu.concatenate %154, %155 in 1 : vector<4x24xf32>, vector<4x8xf32> -> vector<4x32xf32>
    %157 = arith.maximumf %153, %156 : vector<4x32xf32>
    %158 = arith.truncf %157 : vector<4x32xf32> to vector<4x32xbf16>
    %cst_71 = arith.constant dense<0.000000e+00> : vector<4x16xf32>
    %159 = tpu.matmul %158, %111, %cst_71 {dimension_numbers = #tpu.dot_dimension_numbers<[1], [0], [0], [1], [0, 0, 1, 1], [], []>} : vector<4x32xbf16>, vector<32x16xbf16>, vector<4x16xf32> -> vector<4x16xf32>
    %c0_72 = arith.constant 0 : index
    %c0_73 = arith.constant 0 : index
    %160 = vector.load %arg16[%c0_72, %c0_73] : memref<48x16xbf16, #tpu.memory_space<vmem>>, vector<48x16xbf16>
    %c0_74 = arith.constant 0 : index
    %c0_75 = arith.constant 0 : index
    %161 = vector.load %arg17[%c0_74, %c0_75] : memref<4x2xf32, #tpu.memory_space<vmem>>, vector<4x2xf32>
    %c0_76 = arith.constant 0 : index
    %c0_77 = arith.constant 0 : index
    %162 = vector.load %arg18[%c0_76, %c0_77] : memref<16x16xf32, #tpu.memory_space<vmem>>, vector<16x16xf32>
    %c0_78 = arith.constant 0 : index
    %c0_79 = arith.constant 0 : index
    %163 = vector.load %arg19[%c0_78, %c0_79] : memref<2x4xbf16, #tpu.memory_space<vmem>>, vector<2x4xbf16>
    %c0_80 = arith.constant 0 : index
    %c0_81 = arith.constant 0 : index
    %164 = vector.load %arg20[%c0_80, %c0_81] : memref<16x8xbf16, #tpu.memory_space<vmem>>, vector<16x8xbf16>
    %cst_82 = arith.constant 0.000000e+00 : f32
    %165 = vector.broadcast %cst_82 : f32 to vector<1x16xf32>
    %166 = vector.extract_strided_slice %159 {offsets = [0, 0], sizes = [3, 16], strides = [1, 1]} : vector<4x16xf32> to vector<3x16xf32>
    %167 = tpu.concatenate %165, %166 in 0 : vector<1x16xf32>, vector<3x16xf32> -> vector<4x16xf32>
    %168 = vector.extract_strided_slice %161 {offsets = [0, 0], sizes = [4, 1], strides = [1, 1]} : vector<4x2xf32> to vector<4x1xf32>
    %169 = vector.broadcast %168 : vector<4x1xf32> to vector<4x16xf32>
    %170 = arith.mulf %167, %169 : vector<4x16xf32>
    %171 = vector.extract_strided_slice %159 {offsets = [1, 0], sizes = [3, 16], strides = [1, 1]} : vector<4x16xf32> to vector<3x16xf32>
    %172 = tpu.concatenate %171, %165 in 0 : vector<3x16xf32>, vector<1x16xf32> -> vector<4x16xf32>
    %173 = vector.extract_strided_slice %161 {offsets = [0, 1], sizes = [4, 1], strides = [1, 1]} : vector<4x2xf32> to vector<4x1xf32>
    %174 = vector.broadcast %173 : vector<4x1xf32> to vector<4x16xf32>
    %175 = arith.mulf %172, %174 : vector<4x16xf32>
    %176 = tpu.concatenate %170, %159, %175 in 1 : vector<4x16xf32>, vector<4x16xf32>, vector<4x16xf32> -> vector<4x48xf32>
    %177 = arith.truncf %176 : vector<4x48xf32> to vector<4x48xbf16>
    %cst_83 = arith.constant dense<0.000000e+00> : vector<4x16xf32>
    %178 = tpu.matmul %177, %160, %cst_83 {dimension_numbers = #tpu.dot_dimension_numbers<[1], [0], [0], [1], [0, 0, 1, 1], [], []>} : vector<4x48xbf16>, vector<48x16xbf16>, vector<4x16xf32> -> vector<4x16xf32>
    %cst_84 = arith.constant dense<0.000000e+00> : vector<16xf32>
    %179 = vector.multi_reduction <add>, %178, %cst_84 [0] : vector<4x16xf32> to vector<16xf32>
    %180 = vector.shape_cast %179 : vector<16xf32> to vector<1x16xf32>
    %cst_85 = arith.constant 4.000000e+00 : f32
    %181 = vector.broadcast %cst_85 : f32 to vector<1x16xf32>
    %182 = arith.divf %180, %181 : vector<1x16xf32>
    %183 = arith.mulf %178, %178 : vector<4x16xf32>
    %cst_86 = arith.constant dense<0.000000e+00> : vector<16xf32>
    %184 = vector.multi_reduction <add>, %183, %cst_86 [0] : vector<4x16xf32> to vector<16xf32>
    %185 = vector.shape_cast %184 : vector<16xf32> to vector<1x16xf32>
    %cst_87 = arith.constant 4.000000e+00 : f32
    %186 = vector.broadcast %cst_87 : f32 to vector<1x16xf32>
    %187 = arith.divf %185, %186 : vector<1x16xf32>
    %cst_88 = arith.constant dense<0.000000e+00> : vector<1x16xf32>
    %188 = tpu.matmul %182, %162, %cst_88 {dimension_numbers = #tpu.dot_dimension_numbers<[1], [0], [0], [1], [0, 0, 1, 1], [], []>} : vector<1x16xf32>, vector<16x16xf32>, vector<1x16xf32> -> vector<1x16xf32>
    %cst_89 = arith.constant dense<0.000000e+00> : vector<1x16xf32>
    %189 = tpu.matmul %187, %162, %cst_89 {dimension_numbers = #tpu.dot_dimension_numbers<[1], [0], [0], [1], [0, 0, 1, 1], [], []>} : vector<1x16xf32>, vector<16x16xf32>, vector<1x16xf32> -> vector<1x16xf32>
    %190 = arith.mulf %188, %188 : vector<1x16xf32>
    %191 = arith.subf %189, %190 : vector<1x16xf32>
    %cst_90 = arith.constant 0.000000e+00 : f32
    %192 = vector.broadcast %cst_90 : f32 to vector<1x16xf32>
    %193 = arith.maximumf %191, %192 : vector<1x16xf32>
    %194 = vector.broadcast %188 : vector<1x16xf32> to vector<4x16xf32>
    %195 = arith.subf %178, %194 : vector<4x16xf32>
    %196 = math.rsqrt %193 : vector<1x16xf32>
    %197 = vector.broadcast %196 : vector<1x16xf32> to vector<4x16xf32>
    %198 = arith.mulf %195, %197 : vector<4x16xf32>
    %cst_91 = arith.constant 0.000000e+00 : f32
    %199 = vector.broadcast %cst_91 : f32 to vector<4x16xf32>
    %200 = arith.maximumf %198, %199 : vector<4x16xf32>
    %201 = vector.extract_strided_slice %200 {offsets = [1, 0], sizes = [3, 16], strides = [1, 1]} : vector<4x16xf32> to vector<3x16xf32>
    %cst_92 = arith.constant 0.000000e+00 : f32
    %202 = vector.broadcast %cst_92 : f32 to vector<1x16xf32>
    %203 = tpu.concatenate %201, %202 in 0 : vector<3x16xf32>, vector<1x16xf32> -> vector<4x16xf32>
    %204 = arith.maximumf %200, %203 : vector<4x16xf32>
    %205 = arith.truncf %204 : vector<4x16xf32> to vector<4x16xbf16>
    %cst_93 = arith.constant dense<0.000000e+00> : vector<2x16xf32>
    %206 = tpu.matmul %163, %205, %cst_93 {dimension_numbers = #tpu.dot_dimension_numbers<[1], [0], [0], [1], [0, 0, 1, 1], [], []>} : vector<2x4xbf16>, vector<4x16xbf16>, vector<2x16xf32> -> vector<2x16xf32>
    %207 = vector.extract_strided_slice %206 {offsets = [0, 8], sizes = [2, 8], strides = [1, 1]} : vector<2x16xf32> to vector<2x8xf32>
    %cst_94 = arith.constant 0.000000e+00 : f32
    %208 = vector.broadcast %cst_94 : f32 to vector<2x8xf32>
    %209 = tpu.concatenate %207, %208 in 1 : vector<2x8xf32>, vector<2x8xf32> -> vector<2x16xf32>
    %210 = arith.maximumf %206, %209 : vector<2x16xf32>
    %211 = arith.truncf %210 : vector<2x16xf32> to vector<2x16xbf16>
    %cst_95 = arith.constant dense<0.000000e+00> : vector<2x8xf32>
    %212 = tpu.matmul %211, %164, %cst_95 {dimension_numbers = #tpu.dot_dimension_numbers<[1], [0], [0], [1], [0, 0, 1, 1], [], []>} : vector<2x16xbf16>, vector<16x8xbf16>, vector<2x8xf32> -> vector<2x8xf32>
    %c0_96 = arith.constant 0 : index
    %c0_97 = arith.constant 0 : index
    %213 = vector.load %arg21[%c0_96, %c0_97] : memref<8x10xbf16, #tpu.memory_space<vmem>>, vector<8x10xbf16>
    %214 = arith.truncf %212 : vector<2x8xf32> to vector<2x8xbf16>
    %cst_98 = arith.constant dense<0.000000e+00> : vector<2x10xf32>
    %215 = tpu.matmul %214, %213, %cst_98 {dimension_numbers = #tpu.dot_dimension_numbers<[1], [0], [0], [1], [0, 0, 1, 1], [], []>} : vector<2x8xbf16>, vector<8x10xbf16>, vector<2x10xf32> -> vector<2x10xf32>
    %c0_99 = arith.constant 0 : index
    %c0_100 = arith.constant 0 : index
    %216 = vector.load %arg22[%c0_99, %c0_100] : memref<1x10xf32, #tpu.memory_space<vmem>>, vector<1x10xf32>
    %217 = vector.broadcast %216 : vector<1x10xf32> to vector<2x10xf32>
    %218 = arith.addf %215, %217 : vector<2x10xf32>
    %c0_101 = arith.constant 0 : index
    %c0_102 = arith.constant 0 : index
    %219 = vector.load %arg23[%c0_101, %c0_102] : memref<2x10xf32, #tpu.memory_space<vmem>>, vector<2x10xf32>
    tpu.vector_store %arg23[%c0_101, %c0_102], %218 {strides = array<i32>} : memref<2x10xf32, #tpu.memory_space<vmem>>, vector<2x10xf32>,
    return
  }
}

</mosaic_0001>

<bundles_post_ra>
// kernel: convnet_forward.1
= control target key start
LH: loop header
LB: loop body
LE: loop exit
PB: predicated region body
PF: predicated region fallthrough
CT: control target
= control target key end

     0   :  { %s2333_s0 = inlined_call_operand.vmem [shape: f32[32,64], index: 0, kind: input, shape index: {}]   ;;  %s2334_s1 = inlined_call_operand.vmem [shape: bf16[192,128], index: 1, kind: input, shape index: {}]   ;;  %s2335_s2 = inlined_call_operand.vmem [shape: f32[32,2], index: 2, kind: input, shape index: {}]   ;;  %s2336_s3 = inlined_call_operand.vmem [shape: f32[128,128], index: 3, kind: input, shape index: {}]   ;;  %s2337_s4 = inlined_call_operand.vmem [shape: bf16[16,32], index: 4, kind: input, shape index: {}]   ;;  %s2338_s5 = inlined_call_operand.vmem [shape: bf16[128,64], index: 5, kind: input, shape index: {}]   ;;  %s2339_s6 = inlined_call_operand.vmem [shape: bf16[192,64], index: 6, kind: input, shape index: {}]   ;;  %s2340_s7 = inlined_call_operand.vmem [shape: f32[16,2], index: 7, kind: input, shape index: {}]   ;;  %s2341_s8 = inlined_call_operand.vmem [shape: f32[64,64], index: 8, kind: input, shape index: {}]   ;;  %s2342_s9 = inlined_call_operand.vmem [shape: bf16[8,16], index: 9, kind: input, shape index: {}]   ;;  %s2343_s10 = inlined_call_operand.vmem [shape: bf16[64,32], index: 10, kind: input, shape index: {}]   ;;  %s2344_s11 = inlined_call_operand.vmem [shape: bf16[96,32], index: 11, kind: input, shape index: {}]   ;;  %s2345_s12 = inlined_call_operand.vmem [shape: f32[8,2], index: 12, kind: input, shape index: {}]   ;;  %s2346_s13 = inlined_call_operand.vmem [shape: f32[32,32], index: 13, kind: input, shape index: {}]   ;;  %s2347_s14 = inlined_call_operand.vmem [shape: bf16[4,8], index: 14, kind: input, shape index: {}]   ;;  %s2348_s15 = inlined_call_operand.vmem [shape: bf16[32,16], index: 15, kind: input, shape index: {}]   ;;  %s2349_s16 = inlined_call_operand.vmem [shape: bf16[48,16], index: 16, kind: input, shape index: {}]   ;;  %s2350_s17 = inlined_call_operand.vmem [shape: f32[4,2], index: 17, kind: input, shape index: {}]   ;;  %s2351_s18 = inlined_call_operand.vmem [shape: f32[16,16], index: 18, kind: input, shape index: {}]   ;;  %s2352_s19 = inlined_call_operand.vmem [shape: bf16[2,4], index: 19, kind: input, shape index: {}]   ;;  %s2353_s20 = inlined_call_operand.vmem [shape: bf16[16,8], index: 20, kind: input, shape index: {}]   ;;  %s2354_s21 = inlined_call_operand.vmem [shape: bf16[8,10], index: 21, kind: input, shape index: {}]   ;;  %s2355_s22 = inlined_call_operand.vmem [shape: f32[1,10], index: 22, kind: input, shape index: {}]   ;;  %s2356_s23 = inlined_call_operand.hbm [shape: f32[2,10], index: 23, kind: output, shape index: {}]  }
   0x1   :  { %2364 = sst [smem:[#allocation5_spill]] %s2333_s0 }
   0x2   :  { %2365 = sst [smem:[#allocation6_spill]] %s2334_s1 }
   0x3   :  { %2366 = sst [smem:[#allocation7_spill]] %s2335_s2 }
   0x4   :  { %2367 = sst [smem:[#allocation8_spill]] %s2336_s3 }
   0x5   :  { %2368 = sst [smem:[#allocation9_spill]] %s2337_s4 }
   0x6   :  { %2369 = sst [smem:[#allocation10_spill]] %s2338_s5 }
   0x7   :  { %2370 = sst [smem:[#allocation11_spill]] %s2339_s6 }
   0x8   :  { %2371 = sst [smem:[#allocation12_spill]] %s2340_s7 }
   0x9   :  { %s2372_s24 = sld [smem:[#allocation7_spill]]  ;;  %v1802_v1 = vmov 1   ;;  %v1803_v2 = vmov 0   ;;  %s1804_s28 = smov 64  }
   0xa   :  { %1730 = vset.pattern.permute.xlu1 %v1802_v1  ;;  %1729 = vset.pattern.permute.xlu0 %v1803_v2  ;;  %s2373_s1 = sld [smem:[#allocation5_spill]] }
   0xb   :  { %1736 = vset.pattern.permute.xlu2 %v1803_v2  ;;  %s2374_s7 = sld [smem:[#allocation6_spill]] }
   0xf   :  { %v104_v0 = vld [vmem:[%s2372_s24] sm:$0xff] }
  0x10   :  { %v1941_v3 = vld [vmem:[%s2373_s1] sm:$0xff]  ;;  %v1946_v4 = vld [vmem:[%s2373_s1 + $0x8] sm:$0xff]  ;;  %197 = vperm.xlu1 %1730, %v104_v0   ;;  %161 = vperm.xlu0 %1729, %v104_v0  }
  0x11   :  { %v1731_v5 = vpack.i.bf16 %v1946_v4, %v1941_v3  ;;  %v1676_v6 = vld [vmem:[%s2374_s7 + $0x38] sm:$0xff]  ;;  %v1675_v8 = vld [vmem:[%s2374_s7 + $0x30] sm:$0xff] }
  0x12   :  { %v1680_v7 = vld [vmem:[%s2374_s7 + $0x58] sm:$0xff]  ;;  %315 = vmatpush.bf16.msra.mxu0 %v1676_v6 }
  0x13   :  { %1732 = vrot.lane.b32.xlu2 %v1731_v5, %s1804_s28 }
  0x14   :  { %28 = vsyncpa [#allocation3], 0  ;;  %338 = vmatpush.bf16.msra.mxu1 %v1680_v7  ;;  %v105_v9 = vld [vmem:[%s2372_s24 + $0x8] sm:$0xff]  ;;  %v106_v11 = vld [vmem:[%s2372_s24 + $0x10] sm:$0xff]  ;;  %s2375_s27 = sld [smem:[#allocation12_spill]]  ;;  %v147_v28 = vrot.slane %v1941_v3, 7 }
  0x15   :  { %v1674_v10 = vld [vmem:[%s2374_s7 + $0x28] sm:$0xff]  ;;  %v1673_v12 = vld [vmem:[%s2374_s7 + $0x20] sm:$0xff]  ;;  %v107_v13 = vld [vmem:[%s2372_s24 + $0x18] sm:$0xff]  ;;  %vm146_vm0 = vcmask 1040384   ;;  %v184_v29 = vrot.slane %v1941_v3, 1  ;;  %v185_v30 = vrot.slane %v1946_v4, 1 }
  0x16   :  { %316 = vmatpush.bf16.msra.mxu0 %v1675_v8  ;;  %v1672_v14 = vld [vmem:[%s2374_s7 + $0x18] sm:$0xff]  ;;  %v1982_v15 = vld [vmem:[%s2373_s1 + $0x10] sm:$0xff]  ;;  %v1678_v21 = vld [vmem:[%s2374_s7 + $0x48] sm:$0xff]  ;;  %v148_v32 = vrot.slane %v1946_v4, 7  ;;  %vm183_vm1 = vcmask 1046528   ;;  %v158_v33 = vsel %vm146_vm0, 0.0, %v147_v28 }
  0x17   :  { %v1987_v16 = vld [vmem:[%s2373_s1 + $0x18] sm:$0xff]  ;;  %v1679_v19 = vld [vmem:[%s2374_s7 + $0x50] sm:$0xff]  ;;  %v1670_v22 = vld [vmem:[%s2374_s7 + $0x8] sm:$0xff]  ;;  %v187_v31 = vrot.slane %v1982_v15, 1  ;;  %v186_v34 = vsel %vm183_vm1, %v184_v29, %v185_v30  ;;  %vm228_vm2 = vcmask 523264   ;;  %v150_v52 = vrot.slane %v1982_v15, 7 }
  0x18   :  { %201 = vperm.xlu1 %1730, %v105_v9   ;;  %166 = vperm.xlu0 %1729, %v105_v9   ;;  %v1738_v17 = vpack.i.bf16 %v1987_v16, %v1982_v15  ;;  %v1671_v20 = vld [vmem:[%s2374_s7 + $0x10] sm:$0xff]  ;;  %v1677_v23 = vld [vmem:[%s2374_s7 + $0x40] sm:$0xff]  ;;  %v149_v36 = vsel %vm146_vm0, %v147_v28, %v148_v32  ;;  %v189_v50 = vrot.slane %v1987_v16, 1  ;;  %v152_v53 = vrot.slane %v1987_v16, 7  ;;  %s2376_s29 = sld [smem:[#allocation8_spill]]  ;;  %s1806_s24 = smov 120  }
  0x19   :  { %339 = vmatpush.bf16.msra.mxu1 %v1679_v19  ;;  %v1669_v24 = vld [vmem:[%s2374_s7] sm:$0xff]  ;;  %v188_v35 = vsel %vm183_vm1, %v185_v30, %v187_v31  ;;  %v151_v58 = vsel %vm146_vm0, %v148_v32, %v150_v52  ;;  %v1805_v30 = vmov 32.0   ;;  %s2377_s2 = sld [smem:[#allocation9_spill]]  ;;  %vm478_vm7 = vcmask 261120   ;;  %s1808_s0 = smov 32  }
  0x1a   :  { %317 = vmatpush.bf16.msra.mxu0 %v1674_v10  ;;  %v1996_v18 = vld [vmem:[%s2375_s27] sm:$0xff]  ;;  %v190_v55 = vsel %vm183_vm1, %v187_v31, %v189_v50  ;;  %v195_v56 = vsel %vm183_vm1, %v189_v50, 0.0  ;;  %v153_v59 = vsel %vm146_vm0, %v150_v52, %v152_v53  ;;  %1760 = vrcp.f32 %v1805_v30  ;;  %s2378_s7 = sld [smem:[#allocation10_spill]]  ;;  %s1812_s4 = smov [#allocation2]  }
  0x1b   :  { %171 = vperm.xlu2 %1736, %v106_v11   ;;  %vm504_vm8 = vcmask 982016   ;;  %s2379_s5 = sld [smem:[#allocation11_spill]]  ;;  %vm871_vm13 = vcmask 130048   ;;  %vm892_vm14 = vcmask 457728   ;;  %vm1022_vm15 = vcmask 785408  }
  0x1d   :  { %340 = vmatpush.bf16.msra.mxu1 %v1678_v21 }
  0x1e   :  { %318 = vmatpush.bf16.msra.mxu0 %v1673_v12  ;;  %v123_v9 = vld [vmem:[%s2376_s29 + $0x78] sm:$0xff]  ;;  %v122_v10 = vld [vmem:[%s2376_s29 + $0x70] sm:$0xff]  ;;  %v120_v12 = vld [vmem:[%s2376_s29 + $0x60] sm:$0xff] }
  0x1f   :  { %384 = vmatpush.msra.mxu2 %v123_v9  ;;  %404 = vmatpush.msra.mxu3 %v123_v9  ;;  %v117_v15 = vld [vmem:[%s2376_s29 + $0x48] sm:$0xff]  ;;  %v116_v16 = vld [vmem:[%s2376_s29 + $0x40] sm:$0xff]  ;;  %v114_v19 = vld [vmem:[%s2376_s29 + $0x30] sm:$0xff] }
  0x20   :  { %205 = vperm.xlu1 %1730, %v106_v11   ;;  %176 = vperm.xlu0 %1729, %v107_v13   ;;  %v121_v11 = vld [vmem:[%s2376_s29 + $0x68] sm:$0xff]  ;;  %v108_v28 = vld [vmem:[%s2376_s29] sm:$0xff] }
  0x21   :  { %341 = vmatpush.bf16.msra.mxu1 %v1677_v23  ;;  %385 = vmatpush.msra.mxu2 %v122_v10  ;;  %v113_v21 = vld [vmem:[%s2376_s29 + $0x28] sm:$0xff] }
  0x22   :  { %319 = vmatpush.bf16.msra.mxu0 %v1672_v14  ;;  %405 = vmatpush.msra.mxu3 %v122_v10  ;;  %v118_v14 = vld [vmem:[%s2376_s29 + $0x50] sm:$0xff] }
  0x23   :  { %1737 = vset.pattern.permute.xlu2 %v1802_v1  ;;  %386 = vmatpush.msra.mxu2 %v121_v11 }
  0x24   :  { %209 = vperm.xlu2 %1737, %v107_v13   ;;  %406 = vmatpush.msra.mxu3 %v121_v11  ;;  %v119_v13 = vld [vmem:[%s2376_s29 + $0x58] sm:$0xff] }
  0x25   :  { %387 = vmatpush.msra.mxu2 %v120_v12 }
  0x26   :  { %320 = vmatpush.bf16.msra.mxu0 %v1671_v20  ;;  %407 = vmatpush.msra.mxu3 %v120_v12 }
  0x27   :  { %388 = vmatpush.msra.mxu2 %v119_v13 }
  0x28   :  { %1739 = vrot.lane.b32.xlu0 %v1738_v17, %s1804_s28  ;;  %1749 = vset.pattern.permute.xlu1 %v1803_v2  ;;  %v115_v17 = vld [vmem:[%s2376_s29 + $0x38] sm:$0xff] }
  0x29   :  { %1748 = vset.pattern.permute.xlu0 %v1802_v1  ;;  %408 = vmatpush.msra.mxu3 %v119_v13 }
  0x2a   :  { %321 = vmatpush.bf16.msra.mxu0 %v1670_v22  ;;  %389 = vmatpush.msra.mxu2 %v118_v14  ;;  %v112_v22 = vld [vmem:[%s2376_s29 + $0x20] sm:$0xff] }
  0x2b   :  { %409 = vmatpush.msra.mxu3 %v118_v14 }
  0x2c   :  { %642 = vperm.xlu2 %1737, %v1996_v18   ;;  %390 = vmatpush.msra.mxu2 %v117_v15 }
  0x2d   :  { %410 = vmatpush.msra.mxu3 %v117_v15 }
  0x2e   :  { %322 = vmatpush.bf16.msra.mxu0 %v1669_v24  ;;  %391 = vmatpush.msra.mxu2 %v116_v16  ;;  %v111_v24 = vld [vmem:[%s2376_s29 + $0x18] sm:$0xff] }
  0x2f   :  { %411 = vmatpush.msra.mxu3 %v116_v16 }
  0x30   :  { %392 = vmatpush.msra.mxu2 %v115_v17 }
  0x31   :  { %412 = vmatpush.msra.mxu3 %v115_v17 }
  0x32   :  { %393 = vmatpush.msra.mxu2 %v114_v19 }
  0x33   :  { %413 = vmatpush.msra.mxu3 %v114_v19 }
  0x34   :  { %1750 = vset.pattern.permute.xlu2 %v1803_v2  ;;  %394 = vmatpush.msra.mxu2 %v113_v21 }
  0x35   :  { %414 = vmatpush.msra.mxu3 %v113_v21 }
  0x36   :  { %395 = vmatpush.msra.mxu2 %v112_v22 }
  0x37   :  { %415 = vmatpush.msra.mxu3 %v112_v22 }
  0x38   :  { %396 = vmatpush.msra.mxu2 %v111_v24 }
  0x39   :  { %416 = vmatpush.msra.mxu3 %v111_v24 }
  0x6d   :  { %v1733_v25 = vpop.permute.xlu2 %1732 }
  0x6e   :  { %v1735_v38 = vunpack.i.h.bf16 %v1733_v25  ;;  %v1734_v39 = vunpack.i.l.bf16 %v1733_v25  ;;  %v110_v25 = vld [vmem:[%s2376_s29 + $0x10] sm:$0xff] }
  0x6f   :  { %397 = vmatpush.msra.mxu2 %v110_v25  ;;  %417 = vmatpush.msra.mxu3 %v110_v25 }
  0x75   :  { %v172_v45 = vpop.permute.xlu2 %171 }
  0x76   :  { %v181_v63 = vmul.f32 %v172_v45, %v151_v58 }
  0x7e   :  { %v210_v57 = vpop.permute.xlu2 %209 }
  0x7f   :  { %v215_v61 = vmul.f32 %v210_v57, %v195_v56 }
  0x82   :  { %v198_v26 = vpop.permute.xlu1 %197  ;;  %v162_v27 = vpop.permute.xlu0 %161 }
  0x83   :  { %v179_v37 = vmul.f32 %v162_v27, %v158_v33  ;;  %v212_v42 = vmul.f32 %v198_v26, %v186_v34  ;;  %v109_v26 = vld [vmem:[%s2376_s29 + $0x8] sm:$0xff]  ;;  %v1761_v34 = vpop.eup %1760 }
  0x84   :  { %398 = vmatpush.msra.mxu2 %v109_v26  ;;  %418 = vmatpush.msra.mxu3 %v109_v26  ;;  %vm367_vm3 = vweird.f32 %v1761_v34 }
  0x85   :  { %v229_v47 = vsel %vm228_vm2, %v179_v37, %v1734_v39 }
  0x86   :  { %399 = vmatpush.msra.mxu2 %v108_v28  ;;  %419 = vmatpush.msra.mxu3 %v108_v28 }
  0x8a   :  { %v202_v40 = vpop.permute.xlu1 %201  ;;  %v167_v41 = vpop.permute.xlu0 %166 }
  0x8b   :  { %v213_v43 = vmul.f32 %v202_v40, %v188_v35  ;;  %v180_v44 = vmul.f32 %v167_v41, %v149_v36 }
  0x8d   :  { %v234_v46 = vpack.c.bf16 %v213_v43, %v212_v42  ;;  %v230_v48 = vsel %vm228_vm2, %v180_v44, %v1735_v38  ;;  %v363_v38 = vmul.f32 32.0, %v1761_v34 }
  0x8e   :  { %v233_v49 = vpack.c.bf16 %v230_v48, %v229_v47 }
  0x8f   :  { %1502 = vmatmul.msk.bf16.vlgmr.msra.gmra.mxu1 %vm228_vm2, %v234_v46  ;;  %v364_v47 = vsub.f32 1.0, %v363_v38 }
  0x90   :  { %323 = vmatmul.bf16.vlgmr.msra.gmra.mxu0 %v233_v49 }
  0x91   :  { %v365_v53 = vmul.f32 %v1761_v34, %v364_v47 }
  0x92   :  { %v177_v51 = vpop.permute.xlu0 %176  ;;  %v206_v54 = vpop.permute.xlu1 %205 }
  0x93   :  { %v214_v60 = vmul.f32 %v206_v54, %v190_v55  ;;  %v182_v0 = vmul.f32 %v177_v51, %v153_v59  ;;  %v366_v58 = vadd.f32 %v1761_v34, %v365_v53  ;;  %v1685_v53 = vld [vmem:[%s2378_s7 + $0x18] sm:$0xff] }
  0x95   :  { %v236_v5 = vpack.c.bf16 %v215_v61, %v214_v60 }
  0x9a   :  { %v1740_v62 = vpop.permute.xlu0 %1739 }
  0x9b   :  { %v1742_v3 = vunpack.i.h.bf16 %v1740_v62  ;;  %v1741_v4 = vunpack.i.l.bf16 %v1740_v62 }
  0x9d   :  { %v231_v6 = vsel %vm228_vm2, %v181_v63, %v1741_v4  ;;  %v232_v7 = vsel %vm228_vm2, %v182_v0, %v1742_v3  ;;  %v368_v63 = vsel %vm367_vm3, %v1761_v34, %v366_v58  ;;  %v1683_v58 = vld [vmem:[%s2378_s7 + $0x8] sm:$0xff] }
  0x9e   :  { %v235_v8 = vpack.c.bf16 %v232_v7, %v231_v6 }
  0x9f   :  { %1503 = vmatmul.msk.bf16.gmra.mxu1 %vm228_vm2, %v236_v5 }
  0xa0   :  { %328 = vmatmul.bf16.gmra.mxu0 %v235_v8 }
 0x10c   :  { %v343_v20 = vpop.f32.mrf.mxu1 }
 0x10d   :  { %v324_v23 = vpop.f32.mrf.mxu0 }
 0x10e   :  { %v344_v35 = vadd.f32 %v343_v20, %v324_v23 }
 0x110   :  { %v370_v39 = vmul.f32 %v344_v35, %v344_v35 }
 0x114   :  { %v345_v27 = vpop.f32.mrf.mxu1 }
 0x115   :  { %v326_v29 = vpop.f32.mrf.mxu0 }
 0x116   :  { %v2090_v33 = vadd.f32 %v345_v27, %v326_v29 }
 0x118   :  { %v371_v37 = vmul.f32 %v2090_v33, %v2090_v33  ;;  %v353_v40 = vadd.f32 %v2090_v33, %v344_v35 }
 0x11a   :  { %v374_v44 = vadd.f32 %v371_v37, %v370_v39 }
 0x11c   :  { %v348_v31 = vpop.f32.mrf.mxu1 }
 0x11d   :  { %v329_v32 = vpop.f32.mrf.mxu0 }
 0x11e   :  { %v349_v36 = vadd.f32 %v348_v31, %v329_v32 }
 0x120   :  { %v372_v41 = vmul.f32 %v349_v36, %v349_v36  ;;  %v354_v45 = vadd.f32 %v353_v40, %v349_v36 }
 0x122   :  { %v375_v48 = vadd.f32 %v374_v44, %v372_v41 }
 0x124   :  { %v350_v42 = vpop.f32.mrf.mxu1 }
 0x125   :  { %v331_v43 = vpop.f32.mrf.mxu0 }
 0x126   :  { %v351_v46 = vadd.f32 %v350_v42, %v331_v43 }
 0x128   :  { %v355_v49 = vadd.f32 %v354_v45, %v351_v46  ;;  %v373_v50 = vmul.f32 %v351_v46, %v351_v46 }
 0x12a   :  { %v356_v51 = vrot.slane %v355_v49, 4  ;;  %v376_v52 = vadd.f32 %v375_v48, %v373_v50  ;;  %v1681_v48 = vld [vmem:[%s2377_s2] sm:$0xff]  ;;  %v1688_v50 = vld [vmem:[%s2378_s7 + $0x30] sm:$0xff] }
 0x12c   :  { %v357_v54 = vadd.f32 %v356_v51, %v355_v49  ;;  %v377_v55 = vrot.slane %v376_v52, 4  ;;  %v1689_v49 = vld [vmem:[%s2378_s7 + $0x38] sm:$0xff]  ;;  %v1687_v51 = vld [vmem:[%s2378_s7 + $0x28] sm:$0xff] }
 0x12d   :  { %558 = vmatpush.bf16.msrb.mxu1 %v1689_v49  ;;  %v601_v49 = vld [vmem:[%s2341_s8 + $0x18] sm:$0xff] }
 0x12e   :  { %v358_v56 = vrot.slane %v357_v54, 2  ;;  %v378_v57 = vadd.f32 %v377_v55, %v376_v52  ;;  %v1686_v52 = vld [vmem:[%s2378_s7 + $0x20] sm:$0xff] }
 0x130   :  { %v359_v59 = vadd.f32 %v358_v56, %v357_v54  ;;  %v379_v60 = vrot.slane %v378_v57, 2  ;;  %v1684_v54 = vld [vmem:[%s2378_s7 + $0x10] sm:$0xff] }
 0x131   :  { %559 = vmatpush.bf16.msrb.mxu1 %v1688_v50  ;;  %v600_v50 = vld [vmem:[%s2341_s8 + $0x10] sm:$0xff] }
 0x132   :  { %v360_v61 = vrot.slane %v359_v59, 1  ;;  %v380_v62 = vadd.f32 %v379_v60, %v378_v57  ;;  %v597_v60 = vld [vmem:[%s2375_s27 + $0x8] sm:$0xff] }
 0x133   :  { %646 = vperm.xlu0 %1748, %v597_v60   ;;  %630 = vperm.xlu2 %1750, %v597_v60  }
 0x134   :  { %v361_v0 = vadd.f32 %v360_v61, %v359_v59  ;;  %v381_v3 = vrot.slane %v380_v62, 1  ;;  %v1682_v59 = vld [vmem:[%s2378_s7] sm:$0xff] }
 0x135   :  { %560 = vmatpush.bf16.msrb.mxu1 %v1687_v51  ;;  %v599_v51 = vld [vmem:[%s2341_s8 + $0x8] sm:$0xff] }
 0x136   :  { %v369_v4 = vmul.f32 %v368_v63, %v361_v0  ;;  %v382_v5 = vadd.f32 %v381_v3, %v380_v62 }
 0x138   :  { %400 = vmatmul.f32.vlgmr.msra.gmra.mxu2 %v369_v4  ;;  %v383_v6 = vmul.f32 %v382_v5, %v368_v63 }
 0x139   :  { %561 = vmatpush.bf16.msrb.mxu1 %v1686_v52  ;;  %v598_v52 = vld [vmem:[%s2341_s8] sm:$0xff] }
 0x13a   :  { %420 = vmatmul.f32.vlgmr.msra.gmra.mxu3 %v383_v6  ;;  %v1701_v6 = vld [vmem:[%s2379_s5 + $0x58] sm:$0xff] }
 0x13b   :  { %1756 = vset.pattern.permute.xlu2 %v1802_v1  ;;  %754 = vmatpush.bf16.msrb.mxu3 %v1701_v6 }
 0x13d   :  { %562 = vmatpush.bf16.msrb.mxu1 %v1685_v53 }
 0x141   :  { %563 = vmatpush.bf16.msrb.mxu1 %v1684_v54  ;;  %v1807_v54 = vmov 16.0  }
 0x145   :  { %564 = vmatpush.bf16.msrb.mxu1 %v1683_v58 }
 0x149   :  { %565 = vmatpush.bf16.msrb.mxu1 %v1682_v59 }
 0x1bb   :  { %v401_v7 = vpop.f32.mrf.mxu2 }
 0x1bc   :  { %v424_v8 = vmul.f32 %v401_v7, %v401_v7  ;;  %v427_v16 = vperm.slane %v401_v7, 0  ;;  %v1700_v7 = vld [vmem:[%s2379_s5 + $0x50] sm:$0xff] }
 0x1bd   :  { %v421_v9 = vpop.f32.mrf.mxu3  ;;  %755 = vmatpush.bf16.msrb.mxu3 %v1700_v7 }
 0x1be   :  { %v425_v10 = vsub.f32 %v421_v9, %v424_v8  ;;  %v430_v21 = vsub.f32 %v349_v36, %v427_v16  ;;  %v431_v23 = vsub.f32 %v351_v46, %v427_v16  ;;  %v428_v24 = vsub.f32 %v344_v35, %v427_v16  ;;  %v948_v8 = vld [vmem:[%s2345_s12] sm:$0xff]  ;;  %v1699_v9 = vld [vmem:[%s2379_s5 + $0x48] sm:$0xff] }
 0x1bf   :  { %v429_v25 = vsub.f32 %v2090_v33, %v427_v16  ;;  %972 = vperm.xlu0 %1748, %v948_v8   ;;  %v1692_v16 = vld [vmem:[%s2379_s5 + $0x10] sm:$0xff] }
 0x1c0   :  { %v426_v11 = vmax.f32 %v425_v10, 0.0  ;;  %v1698_v10 = vld [vmem:[%s2379_s5 + $0x40] sm:$0xff] }
 0x1c1   :  { %756 = vmatpush.bf16.msrb.mxu3 %v1699_v9 }
 0x1c2   :  { %1762 = vrsqrt.f32 %v426_v11  ;;  %vm438_vm5 = vweird.f32 %v426_v11 }
 0x1c3   :  { %1764 = vrcp.f32 %v1807_v54  ;;  %v1704_v54 = vld [vmem:[%s2343_s10 + $0x10] sm:$0xff] }
 0x1c5   :  { %757 = vmatpush.bf16.msrb.mxu3 %v1698_v10 }
 0x1c7   :  { %1757 = vset.pattern.permute.xlu0 %v1803_v2  ;;  %v1694_v2 = vld [vmem:[%s2379_s5 + $0x20] sm:$0xff] }
 0x1c8   :  { %v1763_v12 = vpop.eup %1762 }
 0x1c9   :  { %v433_v13 = vmul.f32 %v1763_v12, %v426_v11  ;;  %vm439_vm4 = vweird.f32 %v1763_v12  ;;  %v1697_v11 = vld [vmem:[%s2379_s5 + $0x38] sm:$0xff] }
 0x1ca   :  { %vm440_vm6 = vmor %vm438_vm5, %vm439_vm4  ;;  %736 = vmatpush.bf16.msrb.mxu0 %v1697_v11 }
 0x1cb   :  { %v434_v14 = vmul.f32 %v1763_v12, %v433_v13  ;;  %v1695_v13 = vld [vmem:[%s2379_s5 + $0x28] sm:$0xff] }
 0x1cd   :  { %v435_v15 = vmul.f32 0.5, %v434_v14 }
 0x1cf   :  { %v436_v17 = vsub.f32 1.5, %v435_v15  ;;  %v1693_v15 = vld [vmem:[%s2379_s5 + $0x18] sm:$0xff] }
 0x1d1   :  { %v437_v19 = vmul.f32 %v1763_v12, %v436_v17 }
 0x1d3   :  { %v441_v20 = vsel %vm440_vm6, %v1763_v12, %v437_v19  ;;  %v1696_v12 = vld [vmem:[%s2379_s5 + $0x30] sm:$0xff]  ;;  %vm1137_vm6 = vcmask 1043456  }
 0x1d4   :  { %v442_v22 = vperm.slane %v441_v20, 0  ;;  %737 = vmatpush.bf16.msrb.mxu0 %v1696_v12 }
 0x1d6   :  { %v445_v26 = vmul.f32 %v442_v22, %v430_v21  ;;  %v446_v27 = vmul.f32 %v442_v22, %v431_v23  ;;  %v443_v28 = vmul.f32 %v442_v22, %v428_v24  ;;  %v444_v29 = vmul.f32 %v442_v22, %v429_v25  ;;  %v647_v21 = vpop.permute.xlu0 %646  ;;  %v643_v23 = vpop.permute.xlu2 %642 }
 0x1d8   :  { %v449_v30 = vmax.f32 %v445_v26, 0.0  ;;  %v450_v31 = vmax.f32 %v446_v27, 0.0  ;;  %v447_v32 = vmax.f32 %v443_v28, 0.0  ;;  %v448_v34 = vmax.f32 %v444_v29, 0.0  ;;  %738 = vmatpush.bf16.msrb.mxu0 %v1695_v13  ;;  %v1691_v29 = vld [vmem:[%s2379_s5 + $0x8] sm:$0xff] }
 0x1da   :  { %v458_v37 = vrot.slane %v449_v30, 1  ;;  %v460_v38 = vrot.slane %v450_v31, 1  ;;  %v455_v39 = vrot.slane %v447_v32, 1  ;;  %v456_v40 = vrot.slane %v448_v34, 1 }
 0x1dc   :  { %v461_v41 = vsel %vm183_vm1, %v458_v37, %v460_v38  ;;  %v466_v36 = vsel %vm183_vm1, %v460_v38, 0.0  ;;  %v457_v35 = vsel %vm183_vm1, %v455_v39, %v456_v40  ;;  %v459_v33 = vsel %vm183_vm1, %v456_v40, %v458_v37  ;;  %739 = vmatpush.bf16.msrb.mxu0 %v1694_v2 }
 0x1dd   :  { %v469_v42 = vmax.f32 %v449_v30, %v461_v41  ;;  %v470_v43 = vmax.f32 %v450_v31, %v466_v36  ;;  %v467_v45 = vmax.f32 %v447_v32, %v457_v35  ;;  %v468_v46 = vmax.f32 %v448_v34, %v459_v33  ;;  %v1690_v30 = vld [vmem:[%s2379_s5] sm:$0xff]  ;;  %s1445_s5 = sshll.u32 %s2356_s23, 4  ;;  %s1446_s5 = int_to_ptr.hbm [resolvable:$true] %s1445_s5 }
 0x1de   :  { %v631_v38 = vpop.permute.xlu2 %630 }
 0x1df   :  { %v472_v44 = vpack.c.bf16 %v470_v43, %v469_v42  ;;  %v471_v47 = vpack.c.bf16 %v468_v46, %v467_v45  ;;  %v605_v45 = vld [vmem:[%s2341_s8 + $0x38] sm:$0xff]  ;;  %v604_v46 = vld [vmem:[%s2341_s8 + $0x30] sm:$0xff] }
 0x1e0   :  { %740 = vmatpush.bf16.msrb.mxu0 %v1693_v15  ;;  %827 = vmatpush.msra.mxu1 %v605_v45 }
 0x1e1   :  { %488 = vmatpush.bf16.msrb.mxu2 %v472_v44 }
 0x1e2   :  { %828 = vmatpush.msra.mxu1 %v604_v46 }
 0x1e4   :  { %741 = vmatpush.bf16.msrb.mxu0 %v1692_v16 }
 0x1e5   :  { %489 = vmatpush.bf16.msrb.mxu2 %v471_v47  ;;  %v603_v47 = vld [vmem:[%s2341_s8 + $0x28] sm:$0xff] }
 0x1e6   :  { %829 = vmatpush.msra.mxu1 %v603_v47 }
 0x1e8   :  { %1508 = vmatmul.msk.bf16.vlgmr.msrb.gmra.mxu2 %vm478_vm7, %v1681_v48  ;;  %742 = vmatpush.bf16.msrb.mxu0 %v1691_v29  ;;  %v602_v48 = vld [vmem:[%s2341_s8 + $0x20] sm:$0xff] }
 0x1e9   :  { %804 = vmatpush.msra.mxu2 %v605_v45  ;;  %830 = vmatpush.msra.mxu1 %v602_v48 }
 0x1eb   :  { %805 = vmatpush.msra.mxu2 %v604_v46  ;;  %831 = vmatpush.msra.mxu1 %v601_v49 }
 0x1ec   :  { %743 = vmatpush.bf16.msrb.mxu0 %v1690_v30 }
 0x1ed   :  { %806 = vmatpush.msra.mxu2 %v603_v47  ;;  %832 = vmatpush.msra.mxu1 %v600_v50 }
 0x1ef   :  { %807 = vmatpush.msra.mxu2 %v602_v48  ;;  %833 = vmatpush.msra.mxu1 %v599_v51 }
 0x1f1   :  { %808 = vmatpush.msra.mxu2 %v601_v49  ;;  %834 = vmatpush.msra.mxu1 %v598_v52 }
 0x1f3   :  { %809 = vmatpush.msra.mxu2 %v600_v50 }
 0x1f5   :  { %810 = vmatpush.msra.mxu2 %v599_v51 }
 0x1f7   :  { %811 = vmatpush.msra.mxu2 %v598_v52  ;;  %v606_v52 = vld [vmem:[%s2342_s9] sm:$0xf] }
 0x26b   :  { %v491_v55 = vpop.f32.mrf.mxu2 }
 0x273   :  { %v493_v56 = vpop.f32.mrf.mxu2 }
 0x274   :  { %v1743_v57 = vpack.i.bf16 %v493_v56, %v491_v55 }
 0x276   :  { %1744 = vrot.lane.b32.xlu1 %v1743_v57, %s1806_s24 }
 0x27e   :  { %625 = vperm.xlu1 %1749, %v1996_v18  }
 0x2e8   :  { %v1745_v18 = vpop.permute.xlu1 %1744 }
 0x2e9   :  { %v1747_v61 = vunpack.i.h.bf16 %v1745_v18  ;;  %v1746_v62 = vunpack.i.l.bf16 %v1745_v18 }
 0x2eb   :  { %v506_v63 = vsel %vm504_vm8, %v1747_v61, 0.0  ;;  %v505_v0 = vsel %vm504_vm8, %v1746_v62, 0.0  ;;  %vm1133_vm8 = vcmask 64512  }
 0x2ec   :  { %v508_v3 = vmax.f32 %v493_v56, %v506_v63  ;;  %v507_v4 = vmax.f32 %v491_v55, %v505_v0  ;;  %v1765_v56 = vpop.eup %1764 }
 0x2ed   :  { %v774_v58 = vmul.f32 16.0, %v1765_v56  ;;  %vm778_vm9 = vweird.f32 %v1765_v56 }
 0x2ee   :  { %v509_v5 = vpack.c.bf16 %v508_v3, %v507_v4 }
 0x2ef   :  { %v775_v3 = vsub.f32 1.0, %v774_v58  ;;  %v1702_v58 = vld [vmem:[%s2343_s10] sm:$0xff] }
 0x2f0   :  { %566 = vmatmul.bf16.vlgmr.msrb.gmra.mxu1 %v509_v5  ;;  %v626_v31 = vpop.permute.xlu1 %625 }
 0x2f1   :  { %v776_v9 = vmul.f32 %v1765_v56, %v775_v3 }
 0x2f3   :  { %v777_v2 = vadd.f32 %v1765_v56, %v776_v9  ;;  %v1708_v9 = vld [vmem:[%s2344_s11 + $0x10] sm:$0xff] }
 0x36d   :  { %v567_v14 = vpop.f32.mrf.mxu1 }
 0x36e   :  { %v635_v19 = vrot.slane %v567_v14, 1  ;;  %v617_v32 = vrot.slane %v567_v14, 7 }
 0x370   :  { %v622_v37 = vsel %vm146_vm0, 0.0, %v617_v32 }
 0x371   :  { %v633_v41 = vmul.f32 %v626_v31, %v622_v37 }
 0x375   :  { %v569_v17 = vpop.f32.mrf.mxu1 }
 0x376   :  { %v1751_v20 = vpack.i.bf16 %v569_v17, %v567_v14  ;;  %v636_v22 = vrot.slane %v569_v17, 1  ;;  %v618_v34 = vrot.slane %v569_v17, 7 }
 0x378   :  { %v637_v24 = vsel %vm183_vm1, %v635_v19, %v636_v22  ;;  %v640_v25 = vsel %vm183_vm1, %v636_v22, 0.0  ;;  %1752 = vrot.lane.b32.xlu1 %v1751_v20, %s1804_s28  ;;  %v619_v39 = vsel %vm146_vm0, %v617_v32, %v618_v34  ;;  %v779_v19 = vsel %vm778_vm9, %v1765_v56, %v777_v2 }
 0x379   :  { %v649_v26 = vmul.f32 %v643_v23, %v637_v24  ;;  %v650_v27 = vmul.f32 %v647_v21, %v640_v25  ;;  %v634_v36 = vmul.f32 %v631_v38, %v619_v39  ;;  %vm1214_vm9 = vcmask 1042432  }
 0x37b   :  { %v660_v28 = vpack.c.bf16 %v650_v27, %v649_v26 }
 0x37d   :  { %1589 = vmatmul.msk.bf16.vlgmr.msrb.gmra.mxu3 %vm228_vm2, %v660_v28 }
 0x380   :  { %964 = vperm.xlu1 %1749, %v948_v8  }
 0x3ea   :  { %v1753_v40 = vpop.permute.xlu1 %1752 }
 0x3eb   :  { %v1755_v35 = vunpack.i.h.bf16 %v1753_v40  ;;  %v1754_v33 = vunpack.i.l.bf16 %v1753_v40 }
 0x3ed   :  { %v657_v42 = vsel %vm228_vm2, %v633_v41, %v1754_v33  ;;  %v658_v43 = vsel %vm228_vm2, %v634_v36, %v1755_v35 }
 0x3ee   :  { %v659_v44 = vpack.c.bf16 %v658_v43, %v657_v42 }
 0x3f0   :  { %744 = vmatmul.bf16.vlgmr.msrb.gmra.mxu0 %v659_v44 }
 0x3f2   :  { %v965_v2 = vpop.permute.xlu1 %964 }
 0x400   :  { %v759_v53 = vpop.f32.mrf.mxu3 }
 0x408   :  { %v761_v59 = vpop.f32.mrf.mxu3 }
 0x46d   :  { %v745_v55 = vpop.f32.mrf.mxu0 }
 0x46e   :  { %v760_v57 = vadd.f32 %v759_v53, %v745_v55  ;;  %v1705_v53 = vld [vmem:[%s2343_s10 + $0x18] sm:$0xff]  ;;  %v1703_v55 = vld [vmem:[%s2343_s10 + $0x8] sm:$0xff] }
 0x46f   :  { %927 = vmatpush.bf16.msra.mxu3 %v1705_v53 }
 0x470   :  { %v781_v18 = vmul.f32 %v760_v57, %v760_v57  ;;  %v764_v62 = vsel %vm228_vm2, %v760_v57, 0.0 }
 0x472   :  { %v783_v5 = vsel %vm228_vm2, %v781_v18, 0.0 }
 0x473   :  { %928 = vmatpush.bf16.msra.mxu3 %v1704_v54 }
 0x475   :  { %v747_v60 = vpop.f32.mrf.mxu0 }
 0x476   :  { %v762_v61 = vadd.f32 %v761_v59, %v747_v60 }
 0x477   :  { %929 = vmatpush.bf16.msra.mxu3 %v1703_v55 }
 0x478   :  { %v765_v63 = vsel %vm228_vm2, %v762_v61, 0.0  ;;  %v782_v0 = vmul.f32 %v762_v61, %v762_v61 }
 0x479   :  { %v766_v4 = vadd.f32 %v765_v63, %v764_v62 }
 0x47a   :  { %v784_v6 = vsel %vm228_vm2, %v782_v0, 0.0  ;;  %v973_v0 = vpop.permute.xlu0 %972 }
 0x47b   :  { %v767_v7 = vrot.slane %v766_v4, 4  ;;  %v785_v8 = vadd.f32 %v784_v6, %v783_v5  ;;  %930 = vmatpush.bf16.msra.mxu3 %v1702_v58  ;;  %v1711_v6 = vld [vmem:[%s2344_s11 + $0x28] sm:$0xff] }
 0x47c   :  { %1028 = vmatpush.bf16.msra.mxu0 %v1711_v6 }
 0x47d   :  { %v768_v10 = vadd.f32 %v767_v7, %v766_v4  ;;  %v786_v11 = vrot.slane %v785_v8, 4  ;;  %v1710_v7 = vld [vmem:[%s2344_s11 + $0x20] sm:$0xff] }
 0x47f   :  { %v769_v12 = vrot.slane %v768_v10, 2  ;;  %v787_v13 = vadd.f32 %v786_v11, %v785_v8  ;;  %v1709_v8 = vld [vmem:[%s2344_s11 + $0x18] sm:$0xff]  ;;  %v1706_v11 = vld [vmem:[%s2344_s11] sm:$0xff] }
 0x480   :  { %1029 = vmatpush.bf16.msra.mxu0 %v1710_v7 }
 0x481   :  { %v770_v14 = vadd.f32 %v769_v12, %v768_v10  ;;  %v788_v15 = vrot.slane %v787_v13, 2  ;;  %v1707_v10 = vld [vmem:[%s2344_s11 + $0x8] sm:$0xff] }
 0x483   :  { %v771_v16 = vrot.slane %v770_v14, 1  ;;  %v789_v17 = vadd.f32 %v788_v15, %v787_v13 }
 0x484   :  { %1030 = vmatpush.bf16.msra.mxu0 %v1709_v8 }
 0x485   :  { %v772_v20 = vadd.f32 %v771_v16, %v770_v14  ;;  %v790_v21 = vrot.slane %v789_v17, 1 }
 0x487   :  { %v780_v22 = vmul.f32 %v779_v19, %v772_v20  ;;  %v791_v23 = vadd.f32 %v790_v21, %v789_v17  ;;  %v952_v21 = vld [vmem:[%s2346_s13 + $0x18] sm:$0xff] }
 0x488   :  { %1031 = vmatpush.bf16.msra.mxu0 %v1708_v9  ;;  %1078 = vmatpush.msrb.mxu1 %v952_v21 }
 0x489   :  { %1590 = vmatmul.msk.f32.vlgmr.msra.gmra.mxu2 %vm228_vm2, %v780_v22  ;;  %v792_v24 = vmul.f32 %v791_v23, %v779_v19  ;;  %v951_v22 = vld [vmem:[%s2346_s13 + $0x10] sm:$0xff]  ;;  %v950_v23 = vld [vmem:[%s2346_s13 + $0x8] sm:$0xff] }
 0x48a   :  { %1079 = vmatpush.msrb.mxu1 %v951_v22 }
 0x48b   :  { %1591 = vmatmul.msk.f32.vlgmr.msra.gmra.mxu1 %vm228_vm2, %v792_v24  ;;  %v949_v24 = vld [vmem:[%s2346_s13] sm:$0xff]  ;;  %s1443_s13 = sshll.u32 %s1812_s4, 4  ;;  %s1444_s13 = int_to_ptr.vmem [resolvable:$true] %s1443_s13 }
 0x48c   :  { %1032 = vmatpush.bf16.msra.mxu0 %v1707_v10  ;;  %1080 = vmatpush.msrb.mxu1 %v950_v23  ;;  %v953_v10 = vld [vmem:[%s2347_s14] sm:$0x3]  ;;  %s1810_s14 = smov 16  }
 0x48e   :  { %1081 = vmatpush.msrb.mxu1 %v949_v24 }
 0x490   :  { %1033 = vmatpush.bf16.msra.mxu0 %v1706_v11  ;;  %1101 = vmatpush.msra.mxu1 %v952_v21  ;;  %v1713_v11 = vld [vmem:[%s2348_s15 + $0x8] sm:$0xff] }
 0x491   :  { %1183 = vmatpush.bf16.msrb.mxu3 %v1713_v11 }
 0x492   :  { %1102 = vmatpush.msra.mxu1 %v951_v22 }
 0x494   :  { %1103 = vmatpush.msra.mxu1 %v950_v23 }
 0x496   :  { %1104 = vmatpush.msra.mxu1 %v949_v24 }
 0x508   :  { %v836_v27 = vpop.f32.mrf.mxu1 }
 0x50c   :  { %v813_v25 = vpop.f32.mrf.mxu2 }
 0x50d   :  { %v839_v26 = vmul.f32 %v813_v25, %v813_v25  ;;  %v842_v38 = vperm.slane %v813_v25, 0  ;;  %v1809_v25 = vmov 8.0  }
 0x50f   :  { %v840_v28 = vsub.f32 %v836_v27, %v839_v26  ;;  %v843_v41 = vsub.f32 %v760_v57, %v842_v38  ;;  %v844_v36 = vsub.f32 %v762_v61, %v842_v38 }
 0x511   :  { %v841_v29 = vmax.f32 %v840_v28, 0.0 }
 0x513   :  { %1766 = vrsqrt.f32 %v841_v29  ;;  %vm851_vm11 = vweird.f32 %v841_v29 }
 0x514   :  { %1768 = vrcp.f32 %v1809_v25 }
 0x519   :  { %v1767_v30 = vpop.eup %1766 }
 0x51a   :  { %v846_v31 = vmul.f32 %v1767_v30, %v841_v29  ;;  %vm852_vm10 = vweird.f32 %v1767_v30  ;;  %v1769_v26 = vpop.eup %1768 }
 0x51b   :  { %vm853_vm12 = vmor %vm851_vm11, %vm852_vm10  ;;  %v1047_v27 = vmul.f32 8.0, %v1769_v26  ;;  %vm1249_vm10 = vcmask 392192  }
 0x51c   :  { %v847_v32 = vmul.f32 %v1767_v30, %v846_v31 }
 0x51d   :  { %v1048_v28 = vsub.f32 1.0, %v1047_v27  ;;  %v1714_v27 = vld [vmem:[%s2349_s16] sm:$0xff] }
 0x51e   :  { %v848_v34 = vmul.f32 0.5, %v847_v32 }
 0x520   :  { %v849_v37 = vsub.f32 1.5, %v848_v34  ;;  %v1049_v34 = vmul.f32 %v1769_v26, %v1048_v28 }
 0x522   :  { %v850_v39 = vmul.f32 %v1767_v30, %v849_v37 }
 0x524   :  { %v854_v40 = vsel %vm853_vm12, %v1767_v30, %v850_v39 }
 0x525   :  { %v855_v35 = vperm.slane %v854_v40, 0 }
 0x527   :  { %v856_v33 = vmul.f32 %v855_v35, %v843_v41  ;;  %v857_v42 = vmul.f32 %v855_v35, %v844_v36  ;;  %v1050_v36 = vadd.f32 %v1769_v26, %v1049_v34 }
 0x529   :  { %v858_v43 = vmax.f32 %v856_v33, 0.0  ;;  %v859_v44 = vmax.f32 %v857_v42, 0.0 }
 0x52b   :  { %v862_v45 = vrot.slane %v858_v43, 1  ;;  %v863_v46 = vrot.slane %v859_v44, 1 }
 0x52d   :  { %v864_v47 = vsel %vm183_vm1, %v862_v45, %v863_v46  ;;  %v867_v48 = vsel %vm183_vm1, %v863_v46, 0.0 }
 0x52e   :  { %v868_v49 = vmax.f32 %v858_v43, %v864_v47  ;;  %v869_v50 = vmax.f32 %v859_v44, %v867_v48 }
 0x530   :  { %v870_v51 = vpack.c.bf16 %v869_v50, %v868_v49 }
 0x532   :  { %882 = vmatpush.bf16.msrb.mxu2 %v870_v51 }
 0x535   :  { %1592 = vmatmul.msk.bf16.vlgmr.msrb.gmra.mxu2 %vm871_vm13, %v606_v52 }
 0x5b8   :  { %v884_v56 = vpop.f32.mrf.mxu2 }
 0x5b9   :  { %889 = vrot.lane.b32.xlu2 %v884_v56, %s1806_s24 }
 0x5c0   :  { %v886_v57 = vpop.f32.mrf.mxu2 }
 0x613   :  { %v890_v59 = vpop.permute.xlu2 %889 }
 0x614   :  { %v893_v60 = vsel %vm892_vm14, %v890_v59, 0.0 }
 0x615   :  { %v894_v18 = vmax.f32 %v884_v56, %v893_v60 }
 0x617   :  { %v895_v61 = vpack.c.bf16 %v894_v18, %v894_v18 }
 0x619   :  { %1609 = vmatmul.msk.bf16.vlgmr.msra.gmra.mxu3 %vm228_vm2, %v895_v61 }
 0x69c   :  { %v932_v62 = vpop.f32.mrf.mxu3 }
 0x69d   :  { %v968_v63 = vrot.slane %v932_v62, 1  ;;  %976 = vrot.lane.b32.xlu2 %v932_v62, %s1808_s0  ;;  %v959_v12 = vrot.slane %v932_v62, 7 }
 0x69f   :  { %v970_v3 = vsel %vm183_vm1, %v968_v63, 0.0  ;;  %v961_v13 = vsel %vm146_vm0, 0.0, %v959_v12 }
 0x6a0   :  { %v975_v4 = vmul.f32 %v973_v0, %v970_v3  ;;  %v967_v15 = vmul.f32 %v965_v2, %v961_v13  ;;  %v1712_v2 = vld [vmem:[%s2348_s15] sm:$0xff] }
 0x6a1   :  { %1184 = vmatpush.bf16.msrb.mxu3 %v1712_v2 }
 0x6a2   :  { %980 = vrot.lane.b32.xlu0 %v975_v4, %s1804_s28 }
 0x6a4   :  { %v934_v5 = vpop.f32.mrf.mxu3 }
 0x6f7   :  { %v977_v14 = vpop.permute.xlu2 %976 }
 0x6f8   :  { %v983_v16 = vsel %vm478_vm7, %v967_v15, %v977_v14  ;;  %v1196_v14 = vld [vmem:[%s2350_s17] sm:$0xf] }
 0x6f9   :  { %1208 = vperm.xlu0 %1757, %v1196_v14   ;;  %1217 = vperm.xlu2 %1756, %v1196_v14  }
 0x701   :  { %1758 = vset.pattern.permute.xlu0 %v1802_v1  ;;  %v1716_v1 = vld [vmem:[%s2349_s16 + $0x10] sm:$0xff] }
 0x714   :  { %v981_v17 = vpop.permute.xlu0 %980 }
 0x715   :  { %v984_v19 = vsel %vm228_vm2, %v983_v16, %v981_v17  ;;  %vm1051_vm2 = vweird.f32 %v1769_v26 }
 0x716   :  { %v985_v20 = vpack.c.bf16 %v984_v19, %v984_v19  ;;  %v1052_v45 = vsel %vm1051_vm2, %v1769_v26, %v1050_v36  ;;  %v1715_v26 = vld [vmem:[%s2349_s16 + $0x8] sm:$0xff]  ;;  %v1811_v36 = vmov 4.0   ;;  %vm1361_vm2 = vcmask 31744  }
 0x718   :  { %1634 = vmatmul.msk.bf16.vlgmr.msra.gmra.mxu0 %vm1022_vm15, %v985_v20  ;;  %vm1365_vm15 = vcmask 1041408  }
 0x753   :  { %v1218_v21 = vpop.permute.xlu2 %1217 }
 0x795   :  { %v1035_v29 = vpop.f32.mrf.mxu0 }
 0x796   :  { %v1039_v30 = vsel %vm478_vm7, %v1035_v29, 0.0  ;;  %v1054_v31 = vmul.f32 %v1035_v29, %v1035_v29 }
 0x797   :  { %v1040_v32 = vrot.slane %v1039_v30, 4 }
 0x798   :  { %v1055_v37 = vsel %vm478_vm7, %v1054_v31, 0.0 }
 0x799   :  { %v1041_v38 = vadd.f32 %v1040_v32, %v1039_v30  ;;  %v1056_v39 = vrot.slane %v1055_v37, 4 }
 0x79b   :  { %v1042_v40 = vrot.slane %v1041_v38, 2  ;;  %v1057_v41 = vadd.f32 %v1056_v39, %v1055_v37 }
 0x79d   :  { %v1043_v35 = vadd.f32 %v1042_v40, %v1041_v38  ;;  %v1058_v33 = vrot.slane %v1057_v41, 2  ;;  %v1037_v42 = vpop.f32.mrf.mxu0  ;;  %v1198_v40 = vld [vmem:[%s2351_s18 + $0x8] sm:$0xff] }
 0x79e   :  { %1331 = vmatpush.msra.mxu3 %v1198_v40 }
 0x79f   :  { %v1044_v43 = vrot.slane %v1043_v35, 1  ;;  %v1059_v44 = vadd.f32 %v1058_v33, %v1057_v41  ;;  %v1197_v41 = vld [vmem:[%s2351_s18] sm:$0xff] }
 0x7a0   :  { %1332 = vmatpush.msra.mxu3 %v1197_v41 }
 0x7a1   :  { %v1045_v46 = vadd.f32 %v1044_v43, %v1043_v35  ;;  %v1060_v48 = vrot.slane %v1059_v44, 1 }
 0x7a3   :  { %v1053_v47 = vmul.f32 %v1052_v45, %v1045_v46  ;;  %v1061_v49 = vadd.f32 %v1060_v48, %v1059_v44 }
 0x7a5   :  { %1635 = vmatmul.msk.f32.vlgmr.msrb.gmra.mxu1 %vm478_vm7, %v1053_v47  ;;  %v1062_v50 = vmul.f32 %v1061_v49, %v1052_v45 }
 0x7a6   :  { %1258 = vmatpush.bf16.msrb.mxu1 %v1716_v1 }
 0x7aa   :  { %1259 = vmatpush.bf16.msrb.mxu1 %v1715_v26  ;;  %v1717_v26 = vld [vmem:[%s2353_s20] sm:$0xff] }
 0x7ad   :  { %1636 = vmatmul.msk.f32.vlgmr.msra.gmra.mxu1 %vm478_vm7, %v1062_v50 }
 0x7ae   :  { %1260 = vmatpush.bf16.msrb.mxu1 %v1714_v27 }
 0x822   :  { %v1083_v51 = vpop.f32.mrf.mxu1 }
 0x823   :  { %v1109_v52 = vmul.f32 %v1083_v51, %v1083_v51  ;;  %v1112_v18 = vperm.slane %v1083_v51, 0 }
 0x825   :  { %v1113_v63 = vsub.f32 %v1035_v29, %v1112_v18  ;;  %v1209_v29 = vpop.permute.xlu0 %1208 }
 0x82a   :  { %v1106_v53 = vpop.f32.mrf.mxu1 }
 0x82b   :  { %v1110_v54 = vsub.f32 %v1106_v53, %v1109_v52 }
 0x82d   :  { %v1111_v55 = vmax.f32 %v1110_v54, 0.0 }
 0x82f   :  { %1770 = vrsqrt.f32 %v1111_v55  ;;  %vm1120_vm4 = vweird.f32 %v1111_v55 }
 0x830   :  { %1772 = vrcp.f32 %v1811_v36 }
 0x835   :  { %v1771_v56 = vpop.eup %1770 }
 0x836   :  { %v1115_v57 = vmul.f32 %v1771_v56, %v1111_v55  ;;  %vm1121_vm3 = vweird.f32 %v1771_v56  ;;  %v1773_v35 = vpop.eup %1772 }
 0x837   :  { %vm1122_vm5 = vmor %vm1120_vm4, %vm1121_vm3  ;;  %v1275_v33 = vmul.f32 4.0, %v1773_v35 }
 0x838   :  { %v1116_v58 = vmul.f32 %v1771_v56, %v1115_v57 }
 0x839   :  { %v1276_v42 = vsub.f32 1.0, %v1275_v33 }
 0x83a   :  { %v1117_v59 = vmul.f32 0.5, %v1116_v58 }
 0x83b   :  { %v1277_v47 = vmul.f32 %v1773_v35, %v1276_v42 }
 0x83c   :  { %v1118_v60 = vsub.f32 1.5, %v1117_v59 }
 0x83d   :  { %v1278_v53 = vadd.f32 %v1773_v35, %v1277_v47 }
 0x83e   :  { %v1119_v61 = vmul.f32 %v1771_v56, %v1118_v60 }
 0x840   :  { %v1123_v62 = vsel %vm1122_vm5, %v1771_v56, %v1119_v61 }
 0x841   :  { %v1124_v0 = vperm.slane %v1123_v62, 0 }
 0x843   :  { %v1125_v3 = vmul.f32 %v1124_v0, %v1113_v63 }
 0x845   :  { %v1126_v4 = vmax.f32 %v1125_v3, 0.0 }
 0x847   :  { %v1128_v5 = vrot.slane %v1126_v4, 1 }
 0x849   :  { %v1130_v6 = vsel %vm183_vm1, %v1128_v5, 0.0  ;;  %vm1158_vm1 = vcmask 195584  }
 0x84a   :  { %v1131_v7 = vmax.f32 %v1126_v4, %v1130_v6 }
 0x84c   :  { %v1132_v8 = vpack.c.bf16 %v1131_v7, %v1131_v7 }
 0x84e   :  { %v1139_v9 = vsel %vm1137_vm6, %v1132_v8, 0 }
 0x84f   :  { %1148 = vmatpush.bf16.msra.mxu2 %v1139_v9 }
 0x852   :  { %1637 = vmatmul.msk.bf16.vlgmr.msra.gmra.mxu2 %vm1133_vm8, %v953_v10 }
 0x853   :  { %1308 = vmatpush.msrb.mxu2 %v1198_v40 }
 0x855   :  { %1309 = vmatpush.msrb.mxu2 %v1197_v41 }
 0x857   :  { %1405 = vmatpush.bf16.msra.mxu2 %v1717_v26 }
 0x8d5   :  { %v1150_v12 = vpop.f32.mrf.mxu2 }
 0x8d6   :  { %1155 = vrot.lane.b32.xlu1 %v1150_v12, %s1806_s24 }
 0x8dd   :  { %v1152_v13 = vpop.f32.mrf.mxu2 }
 0x948   :  { %v1156_v15 = vpop.permute.xlu1 %1155 }
 0x949   :  { %v1159_v16 = vsel %vm1158_vm1, %v1156_v15, 0.0 }
 0x94a   :  { %v1160_v17 = vmax.f32 %v1150_v12, %v1159_v16 }
 0x94c   :  { %v1161_v19 = vpack.c.bf16 %v1160_v17, %v1160_v17 }
 0x94e   :  { %1646 = vmatmul.msk.bf16.vlgmr.msrb.gmra.mxu3 %vm478_vm7, %v1161_v19 }
 0x9d1   :  { %v1186_v20 = vpop.f32.mrf.mxu3 }
 0x9d2   :  { %1221 = vrot.lane.b32.xlu1 %v1186_v20, %s1810_s14  ;;  %v1212_v22 = vrot.slane %v1186_v20, 1  ;;  %v1203_v28 = vrot.slane %v1186_v20, 7 }
 0x9d4   :  { %v1215_v23 = vsel %vm1214_vm9, %v1212_v22, 0.0  ;;  %v1205_v30 = vsel %vm146_vm0, 0.0, %v1203_v28  ;;  %vm1266_vm0 = vcmask 125952  }
 0x9d5   :  { %v1220_v24 = vmul.f32 %v1218_v21, %v1215_v23  ;;  %v1211_v31 = vmul.f32 %v1209_v29, %v1205_v30 }
 0x9d7   :  { %1225 = vrot.lane.b32.xlu2 %v1220_v24, %s1808_s0  ;;  %v1199_v24 = vld [vmem:[%s2352_s19] sm:$0x1] }
 0x9d9   :  { %v1188_v25 = vpop.f32.mrf.mxu3 }
 0xa31   :  { %v1226_v34 = vpop.permute.xlu2 %1225 }
 0xa44   :  { %v1222_v32 = vpop.permute.xlu1 %1221 }
 0xa45   :  { %v1228_v37 = vsel %vm871_vm13, %v1211_v31, %v1222_v32  ;;  %v1411_v31 = vld [vmem:[%s2354_s21] sm:$0xf] }
 0xa46   :  { %v1229_v38 = vsel %vm478_vm7, %v1228_v37, %v1226_v34  ;;  %vm1279_vm7 = vweird.f32 %v1773_v35  ;;  %v1421_v32 = vsel %vm1137_vm6, %v1411_v31, 0 }
 0xa47   :  { %v1230_v39 = vpack.c.bf16 %v1229_v38, %v1229_v38  ;;  %v1280_v59 = vsel %vm1279_vm7, %v1773_v35, %v1278_v53  ;;  %1430 = vmatpush.bf16.msrb.mxu3 %v1421_v32 }
 0xa49   :  { %1659 = vmatmul.msk.bf16.vlgmr.msrb.gmra.mxu1 %vm1249_vm10, %v1230_v39  ;;  %v1759_v39 = vld [vmem:[%s2355_s22] ss:$0 sm:$0xff] }
 0xac6   :  { %v1262_v43 = vpop.f32.mrf.mxu1 }
 0xac7   :  { %v1267_v44 = vsel %vm1266_vm0, %v1262_v43, 0.0  ;;  %v1282_v45 = vmul.f32 %v1262_v43, %v1262_v43 }
 0xac8   :  { %v1268_v46 = vrot.slane %v1267_v44, 4 }
 0xac9   :  { %v1283_v48 = vsel %vm1266_vm0, %v1282_v45, 0.0 }
 0xaca   :  { %v1269_v49 = vadd.f32 %v1268_v46, %v1267_v44  ;;  %v1284_v50 = vrot.slane %v1283_v48, 4 }
 0xacc   :  { %v1270_v51 = vrot.slane %v1269_v49, 2  ;;  %v1285_v52 = vadd.f32 %v1284_v50, %v1283_v48 }
 0xace   :  { %v1271_v54 = vadd.f32 %v1270_v51, %v1269_v49  ;;  %v1286_v55 = vrot.slane %v1285_v52, 2  ;;  %v1264_v56 = vpop.f32.mrf.mxu1 }
 0xad0   :  { %v1272_v57 = vrot.slane %v1271_v54, 1  ;;  %v1287_v58 = vadd.f32 %v1286_v55, %v1285_v52 }
 0xad2   :  { %v1273_v60 = vadd.f32 %v1272_v57, %v1271_v54  ;;  %v1288_v18 = vrot.slane %v1287_v58, 1 }
 0xad4   :  { %v1281_v61 = vmul.f32 %v1280_v59, %v1273_v60  ;;  %v1289_v62 = vadd.f32 %v1288_v18, %v1287_v58 }
 0xad6   :  { %1660 = vmatmul.msk.f32.vlgmr.msrb.gmra.mxu2 %vm871_vm13, %v1281_v61  ;;  %v1290_v63 = vmul.f32 %v1289_v62, %v1280_v59 }
 0xad8   :  { %1661 = vmatmul.msk.f32.vlgmr.msra.gmra.mxu3 %vm871_vm13, %v1290_v63 }
 0xb59   :  { %v1311_v0 = vpop.f32.mrf.mxu2 }
 0xb5a   :  { %v1337_v3 = vmul.f32 %v1311_v0, %v1311_v0  ;;  %v1340_v12 = vperm.slane %v1311_v0, 0 }
 0xb5b   :  { %v1334_v4 = vpop.f32.mrf.mxu3 }
 0xb5c   :  { %v1338_v5 = vsub.f32 %v1334_v4, %v1337_v3  ;;  %v1341_v14 = vsub.f32 %v1262_v43, %v1340_v12 }
 0xb5e   :  { %v1339_v6 = vmax.f32 %v1338_v5, 0.0 }
 0xb60   :  { %1774 = vrsqrt.f32 %v1339_v6  ;;  %vm1348_vm12 = vweird.f32 %v1339_v6 }
 0xb66   :  { %v1775_v7 = vpop.eup %1774 }
 0xb67   :  { %v1343_v8 = vmul.f32 %v1775_v7, %v1339_v6  ;;  %vm1349_vm11 = vweird.f32 %v1775_v7 }
 0xb68   :  { %vm1350_vm14 = vmor %vm1348_vm12, %vm1349_vm11 }
 0xb69   :  { %v1344_v9 = vmul.f32 %v1775_v7, %v1343_v8 }
 0xb6b   :  { %v1345_v10 = vmul.f32 0.5, %v1344_v9 }
 0xb6d   :  { %v1346_v11 = vsub.f32 1.5, %v1345_v10 }
 0xb6f   :  { %v1347_v13 = vmul.f32 %v1775_v7, %v1346_v11 }
 0xb71   :  { %v1351_v2 = vsel %vm1350_vm14, %v1775_v7, %v1347_v13 }
 0xb72   :  { %v1352_v15 = vperm.slane %v1351_v2, 0 }
 0xb74   :  { %v1353_v16 = vmul.f32 %v1352_v15, %v1341_v14 }
 0xb76   :  { %v1354_v17 = vmax.f32 %v1353_v16, 0.0 }
 0xb78   :  { %v1356_v19 = vrot.slane %v1354_v17, 1 }
 0xb7a   :  { %v1358_v20 = vsel %vm1214_vm9, %v1356_v19, 0.0 }
 0xb7b   :  { %v1359_v21 = vmax.f32 %v1354_v17, %v1358_v20 }
 0xb7d   :  { %v1360_v22 = vpack.c.bf16 %v1359_v21, %v1359_v21 }
 0xb7f   :  { %v1367_v23 = vsel %vm1365_vm15, %v1360_v22, 0 }
 0xb80   :  { %1376 = vmatpush.bf16.msrb.mxu0 %v1367_v23 }
 0xb83   :  { %1662 = vmatmul.msk.bf16.vlgmr.msrb.gmra.mxu0 %vm1361_vm2, %v1199_v24 }
 0xc00   :  { %v1378_v25 = vpop.f32.mrf.mxu0 }
 0xc01   :  { %1383 = vrot.lane.b32.xlu1 %v1378_v25, %s1806_s24 }
 0xc08   :  { %v1380_v1 = vpop.f32.mrf.mxu0 }
 0xc73   :  { %v1384_v27 = vpop.permute.xlu1 %1383 }
 0xc74   :  { %v1386_v28 = vsel %vm1133_vm8, %v1384_v27, 0.0 }
 0xc75   :  { %v1387_v29 = vmax.f32 %v1378_v25, %v1386_v28 }
 0xc77   :  { %v1388_v30 = vpack.c.bf16 %v1387_v29, %v1387_v29 }
 0xc79   :  { %1667 = vmatmul.msk.bf16.vlgmr.msra.gmra.mxu2 %vm871_vm13, %v1388_v30  ;;  %vm1436_vm13 = vcmask 74752  }
 0xcfc   :  { %v1407_v34 = vpop.f32.mrf.mxu2 }
 0xcfd   :  { %v1412_v37 = vpack.c.bf16 %v1407_v34, %v1407_v34 }
 0xcff   :  { %1668 = vmatmul.msk.bf16.vlgmr.msrb.gmra.mxu3 %vm1133_vm8, %v1412_v37 }
 0xd04   :  { %v1409_v38 = vpop.f32.mrf.mxu2 }
 0xd82   :  { %v1432_v40 = vpop.f32.mrf.mxu3 }
 0xd83   :  { %v1433_v41 = vadd.f32 %v1759_v39, %v1432_v40 }
 0xd85   :  { %1437 = vst.msk [vmem:[#allocation2] sm:$0x3] %vm1436_vm13, %v1433_v41 }
 0xd86   :  { %1448 = dma.vmem_to_hbm [thread:$0]  %s1444_s13, 32, %s1446_s5, [#allocation3]  }
 0xd8a   :  { %v1434_v36 = vpop.f32.mrf.mxu3 }
 0xd8b   :  { %1800 = dma.done.wait [#allocation3], 32  }
 0xd8c   :  { %1801 = vsyncadd [#allocation3], 4294967264 }
 0xd8d   :  { %1453 = vsyncpa [#allocation3], 1 }

</bundles_post_ra>
